<compile_context>
chip_gen: v7x
topology: tpu7x:2x2x1
jax: 0.10.0
libtpu: 0.0.40
codegen_flags: <defaults>
</compile_context>

<pallas_src>
import functools

import jax
import jax.numpy as jnp
from jax.experimental import pallas as pl
from jax.experimental.pallas import tpu as pltpu

BN_EPS = 1e-5
LANE = 128


def _round_up(x, m):
    return (x + m - 1) // m * m


def _vmem_capacity_bytes():
    """Physical per-core VMEM; conservative 64 MiB (v7x) if the query fails."""
    try:
        cap = getattr(pltpu.get_tpu_info(), "vmem_capacity_bytes", None)
        if cap:
            return int(cap)
    except Exception:
        pass
    return 64 * 1024 * 1024


def _pick_tile_h(H, W, Cin, Cp, in_isz, y_isz, budget_bytes, row_align):
    """Largest divisor of H whose per-step working set fits `budget_bytes`.

    tile_h*W must be a multiple of `row_align` so the flattened (rows, Cp)
    conv-output block is sublane-aligned.  Fallback tile_h = H: rows == H*W is
    then the full second-minor dim of the (N, H*W, Cp) output array, which is
    always a legal block (fixes the old N>1 fallback hazard).
    """
    cands = [t for t in range(1, H + 1) if H % t == 0 and (t * W) % row_align == 0]
    if not cands:
        return H
    wp_pad = _round_up(W + 2, 8)
    cin_pad = _round_up(Cin, LANE)       # lane padding of the Cin-minor halo block
    k_pad = _round_up(9 * Cin, LANE)

    def step_bytes(t):
        rows = t * W
        halo = (t + 2) * wp_pad * cin_pad * in_isz      # input halo tile
        y_t = rows * Cp * y_isz                         # conv output tile
        col = rows * k_pad * in_isz                     # im2col tile
        acc = rows * Cp * 4                             # f32 matmul result
        return 2 * halo + 2 * y_t + col + acc           # ins/outs double-buffered

    fit = [t for t in cands if step_bytes(t) <= budget_bytes]
    return max(fit) if fit else min(cands)


def _pick_spatial_tile(HW, Cp, Cout, y_isz, budget_bytes):
    """Pass-2 spatial tile: a multiple of 128 dividing H*W (lane-dense NCHW
    stores, no masked tail), as large as the budget allows; fallback = H*W."""
    cands = [r for r in range(LANE, HW + 1, LANE) if HW % r == 0]
    if not cands:
        return HW

    def step_bytes(r):
        return 2 * r * Cp * y_isz + 2 * r * Cout * 4 + 2 * r * Cp * 4

    fit = [r for r in cands if step_bytes(r) <= budget_bytes]
    return max(fit) if fit else min(cands)


def _conv_stats_kernel(xh_ref, w_ref, y_ref, stats_ref, *, tile_h, out_w, cin):
    """One (batch, row-tile) step: 3x3 conv as a single K=9*Cin MXU matmul,
    plus numerically-stable partial BN statistics.

    xh_ref:    (tile_h+2, W+2, Cin)  halo row tile (auto-pipelined)
    w_ref:     (9*Cin, Cp)           HWIO weights flattened, Cout padded to Cp
    y_ref:     (rows, Cp)            conv output rows (f32 or bf16)
    stats_ref: (2, Cp)               [sum, tile-centered sum-of-squares]
    """
    rows = tile_h * out_w

    # Build the im2col tile in VMEM/vregs (one gather; never through HBM):
    # col[(h, w), (3*dy+dx)*Cin + ci] = x_pad[h+dy, w+dx, ci].
    taps = []
    for dy in range(3):
        for dx in range(3):
            taps.append(xh_ref[pl.ds(dy, tile_h), pl.ds(dx, out_w), :])
    col = jnp.concatenate(taps, axis=-1).reshape(rows, 9 * cin)

    # Single MXU matmul with K = 9*Cin; accumulation stays inside the MXU.
    acc = jnp.dot(col, w_ref[...], preferred_element_type=jnp.float32)
    y_ref[...] = acc.astype(y_ref.dtype)

    # Partial BN stats: per-tile sum and per-tile-centered M2 (combined with
    # Chan's formula in the glue) -- avoids E[x^2] - mean^2 cancellation.
    s = jnp.sum(acc, axis=0, keepdims=True)             # (1, Cp)
    d = acc - s * (1.0 / rows)
    m2 = jnp.sum(d * d, axis=0, keepdims=True)          # (1, Cp)
    stats_ref[...] = jnp.concatenate([s, m2], axis=0)   # one (2, Cp) store


def _bn_relu_nchw_kernel(y_ref, scale_ref, shift_ref, o_ref):
    """Fused BN affine + ReLU; emits NCHW directly (in-kernel XLU transpose,
    channel padding dropped on the store) -- no post-kernel XLA transpose."""
    y = y_ref[...].astype(jnp.float32)                     # (s_rows, Cp)
    z = jnp.maximum(y * scale_ref[...] + shift_ref[...], 0.0)
    zt = z.T                                               # (Cp, s_rows)
    o_ref[...] = zt[: o_ref.shape[0], :].astype(o_ref.dtype)


def conv_block_forward(x_nchw, w_oihw, b, gamma, beta, *, use_bf16=False):
    """x_nchw: (N, Cin, H, W) float32. Returns (N, Cout, H, W) float32.

    use_bf16: bf16 MXU operands + bf16 conv intermediate (f32 accumulation and
    BN statistics preserved). ~2-4x MXU throughput on v5e and ~1/3 less HBM
    traffic everywhere; parity relaxes to ~1e-2.
    """
    N, Cin, H, W = x_nchw.shape
    Cout, _, KH, KW = w_oihw.shape
    assert (KH, KW) == (3, 3)
    del b  # conv bias cancels exactly under train-mode BatchNorm

    Cp = _round_up(Cout, LANE)                     # lane-dense channel dim
    compute_dtype = jnp.bfloat16 if use_bf16 else jnp.float32
    y_dtype = jnp.bfloat16 if use_bf16 else jnp.float32
    in_isz = jnp.dtype(compute_dtype).itemsize
    y_isz = jnp.dtype(y_dtype).itemsize
    HW = H * W
    M = N * HW
    Wp = W + 2

    # ---- per-generation VMEM budgets (128 MiB on v5e/v6e, 64 MiB on v7x) ----
    vmem_cap = _vmem_capacity_bytes()
    vmem_limit = int(vmem_cap * 3 // 4)
    w_vmem = 2 * 9 * Cin * Cp * in_isz             # weights, assume double-buffered
    tile_budget = max(2 << 20, vmem_cap // 10 - w_vmem)
    pass2_budget = max(2 << 20, vmem_cap // 8)

    row_align = 8 if y_isz == 4 else 16            # sublane alignment for the y tile
    tile_h = _pick_tile_h(H, W, Cin, Cp, in_isz, y_isz, tile_budget, row_align)
    n_ht = H // tile_h
    rows = tile_h * W

    # ---- layout glue (module boundary is NCHW; compute in NHWC) ----
    x_nhwc = jnp.transpose(x_nchw, (0, 2, 3, 1))
    xp = jnp.pad(x_nhwc, ((0, 0), (1, 1), (1, 1), (0, 0))).astype(compute_dtype)
    # Overlapping halo row tiles (one fused XLA copy; replaces the old
    # whole-padded-image-resident block): xh[b, t] = xp[b, t*th : t*th+th+2].
    xh = jnp.stack(
        [xp[:, t * tile_h: t * tile_h + tile_h + 2] for t in range(n_ht)], axis=1)

    # (Cout, Cin, 3, 3) -> (3, 3, Cin, Cout) -> (9*Cin, Cp): K-folded weights.
    w_k = jnp.transpose(w_oihw, (2, 3, 1, 0)).reshape(9 * Cin, Cout)
    w_pad = jnp.pad(w_k, ((0, 0), (0, Cp - Cout))).astype(compute_dtype)

    g_pad = jnp.pad(gamma.astype(jnp.float32), (0, Cp - Cout))
    beta_pad = jnp.pad(beta.astype(jnp.float32), (0, Cp - Cout))

    # ---------------- pass 1: conv + partial BN stats ----------------
    cost1 = pl.CostEstimate(
        flops=2 * M * 9 * Cin * Cp,
        transcendentals=0,
        bytes_accessed=int(xh.size) * in_isz + int(w_pad.size) * in_isz
        + M * Cp * y_isz + N * n_ht * 2 * Cp * 4,
    )
    y_conv, stats = pl.pallas_call(
        functools.partial(_conv_stats_kernel, tile_h=tile_h, out_w=W, cin=Cin),
        out_shape=(
            jax.ShapeDtypeStruct((N, HW, Cp), y_dtype),
            jax.ShapeDtypeStruct((N, n_ht, 2, Cp), jnp.float32),
        ),
        grid=(N, n_ht),
        in_specs=[
            pl.BlockSpec((None, None, tile_h + 2, Wp, Cin),
                         lambda bi, ti: (bi, ti, 0, 0, 0)),
            # TODO(synk): grid-invariant weights could be single-buffered
            # (pl.Buffered(1)); VMEM budget assumes two copies instead.
            pl.BlockSpec((9 * Cin, Cp), lambda bi, ti: (0, 0)),
        ],
        out_specs=(
            pl.BlockSpec((None, rows, Cp), lambda bi, ti: (bi, ti, 0)),
            pl.BlockSpec((None, None, 2, Cp), lambda bi, ti: (bi, ti, 0, 0)),
        ),
        compiler_params=pltpu.CompilerParams(
            dimension_semantics=("parallel", "parallel"),
            vmem_limit_bytes=vmem_limit),
        cost_estimate=cost1,
    )(xh, w_pad)

    # -------- glue: combine partial stats (Chan) -> per-channel scale/shift --------
    sum_t = stats[:, :, 0, :].reshape(N * n_ht, Cp)
    m2_t = stats[:, :, 1, :].reshape(N * n_ht, Cp)
    count = jnp.float32(M)
    mean = jnp.sum(sum_t, axis=0) / count
    mu_t = sum_t / jnp.float32(rows)
    m2 = jnp.sum(m2_t, axis=0) + jnp.float32(rows) * jnp.sum((mu_t - mean) ** 2, axis=0)
    var = jnp.maximum(m2 / count, 0.0)                    # biased var (BN normalization)
    scale = g_pad * jax.lax.rsqrt(var + BN_EPS)           # (Cp,)
    shift = beta_pad - mean * scale
    scale2 = scale.reshape(1, Cp)
    shift2 = shift.reshape(1, Cp)

    # ---------------- pass 2: BN affine + ReLU, NCHW output ----------------
    s_rows = _pick_spatial_tile(HW, Cp, Cout, y_isz, pass2_budget)
    n_st = HW // s_rows
    cost2 = pl.CostEstimate(
        flops=3 * M * Cp,
        transcendentals=0,
        bytes_accessed=M * Cp * y_isz + N * Cout * HW * 4 + 2 * Cp * 4)
    out_nchw = pl.pallas_call(
        _bn_relu_nchw_kernel,
        out_shape=jax.ShapeDtypeStruct((N, Cout, HW), jnp.float32),
        grid=(N, n_st),
        in_specs=[
            pl.BlockSpec((None, s_rows, Cp), lambda bi, si: (bi, si, 0)),
            pl.BlockSpec((1, Cp), lambda bi, si: (0, 0)),
            pl.BlockSpec((1, Cp), lambda bi, si: (0, 0)),
        ],
        out_specs=pl.BlockSpec((None, Cout, s_rows), lambda bi, si: (bi, 0, si)),
        compiler_params=pltpu.CompilerParams(
            dimension_semantics=("parallel", "parallel"),
            vmem_limit_bytes=vmem_limit),
        cost_estimate=cost2,
    )(y_conv, scale2, shift2)

    # (N, Cout, H*W) -> (N, Cout, H, W): contiguous reshape, no copy.
    return out_nchw.reshape(N, Cout, H, W)


def reference_forward(x, w, b, gamma, beta):
    """Pure-JAX reference mirroring the PyTorch ConvBlock.forward (train-mode BN)."""
    y = jax.lax.conv_general_dilated(
        x, w, window_strides=(1, 1), padding=((1, 1), (1, 1)),
        dimension_numbers=("NCHW", "OIHW", "NCHW"))
    y = y + b[None, :, None, None]
    mean = jnp.mean(y, axis=(0, 2, 3), keepdims=True)
    var = jnp.mean((y - mean) ** 2, axis=(0, 2, 3), keepdims=True)
    z = (y - mean) * jax.lax.rsqrt(var + BN_EPS)
    z = z * gamma[None, :, None, None] + beta[None, :, None, None]
    return jnp.maximum(z, 0.0)


if __name__ == "__main__":
    N, Cin, Cout, H, W = 2, 4, 8, 16, 16

    key = jax.random.PRNGKey(0)
    kx, kw, kb, kg, kbeta = jax.random.split(key, 5)

    x = jax.random.normal(kx, (N, Cin, H, W), dtype=jnp.float32)
    w = jax.random.normal(kw, (Cout, Cin, 3, 3), dtype=jnp.float32) * 0.1
    b = jax.random.normal(kb, (Cout,), dtype=jnp.float32) * 0.1
    gamma = 1.0 + 0.1 * jax.random.normal(kg, (Cout,), dtype=jnp.float32)
    beta = 0.1 * jax.random.normal(kbeta, (Cout,), dtype=jnp.float32)

    ref = jax.block_until_ready(reference_forward(x, w, b, gamma, beta))

    # Exact-parity path (f32 MXU operands, f32 intermediate).
    out = jax.block_until_ready(
        jax.jit(functools.partial(conv_block_forward, use_bf16=False))(
            x, w, b, gamma, beta))
    assert out.shape == (N, Cout, H, W)
    assert jnp.allclose(out, ref, atol=1e-4, rtol=1e-4), "f32 path mismatch vs reference"

    # Fast path (bf16 MXU operands + bf16 intermediate, f32 accumulation).
    out_bf16 = jax.block_until_ready(
        jax.jit(functools.partial(conv_block_forward, use_bf16=True))(
            x, w, b, gamma, beta))
    assert jnp.allclose(out_bf16, ref, atol=5e-2, rtol=5e-2), "bf16 path mismatch vs reference"

    print("KERNEL_OK")
</pallas_src>

<mosaic_0001>
module attributes {stable_mosaic.version = 11 : i64} {
  func.func @_bn_relu_nchw_kernel(%arg0: i32, %arg1: i32, %arg2: memref<1x256x128xf32, #tpu.memory_space<vmem>>, %arg3: memref<1x128xf32, #tpu.memory_space<vmem>>, %arg4: memref<1x128xf32, #tpu.memory_space<vmem>>, %arg5: memref<1x8x256xf32, #tpu.memory_space<vmem>>) attributes {dimension_semantics = [#tpu.dimension_semantics<parallel>, #tpu.dimension_semantics<parallel>], iteration_bounds = array<i64: 2, 1>, scalar_prefetch = 0 : i64, scratch_operands = 0 : i64, tpu.core_type = #tpu.core_type<tc>, window_params = [{transform_indices = @transform_0, window_bounds = array<i64: 1, 256, 128>}, {pipeline_mode = #tpu.pipeline_mode<synchronous>, transform_indices = @transform_1, window_bounds = array<i64: 1, 128>}, {pipeline_mode = #tpu.pipeline_mode<synchronous>, transform_indices = @transform_2, window_bounds = array<i64: 1, 128>}, {transform_indices = @transform_3, window_bounds = array<i64: 1, 8, 256>}]} {
    %c0 = arith.constant 0 : index
    %c0_0 = arith.constant 0 : index
    %c0_1 = arith.constant 0 : index
    %0 = vector.load %arg2[%c0, %c0_0, %c0_1] : memref<1x256x128xf32, #tpu.memory_space<vmem>>, vector<1x256x128xf32>
    %1 = vector.shape_cast %0 : vector<1x256x128xf32> to vector<256x128xf32>
    %c0_2 = arith.constant 0 : index
    %c0_3 = arith.constant 0 : index
    %2 = vector.load %arg3[%c0_2, %c0_3] : memref<1x128xf32, #tpu.memory_space<vmem>>, vector<1x128xf32>
    %3 = vector.broadcast %2 : vector<1x128xf32> to vector<256x128xf32>
    %4 = arith.mulf %1, %3 : vector<256x128xf32>
    %c0_4 = arith.constant 0 : index
    %c0_5 = arith.constant 0 : index
    %5 = vector.load %arg4[%c0_4, %c0_5] : memref<1x128xf32, #tpu.memory_space<vmem>>, vector<1x128xf32>
    %6 = vector.broadcast %5 : vector<1x128xf32> to vector<256x128xf32>
    %7 = arith.addf %4, %6 : vector<256x128xf32>
    %cst = arith.constant 0.000000e+00 : f32
    %8 = vector.broadcast %cst : f32 to vector<256x128xf32>
    %9 = arith.maximumf %7, %8 : vector<256x128xf32>
    %10 = tpu.transpose %9, [1, 0] : vector<256x128xf32> -> vector<128x256xf32>
    %11 = vector.extract_strided_slice %10 {offsets = [0, 0], sizes = [8, 256], strides = [1, 1]} : vector<128x256xf32> to vector<8x256xf32>
    %c0_6 = arith.constant 0 : index
    %c0_7 = arith.constant 0 : index
    %c0_8 = arith.constant 0 : index
    %12 = vector.load %arg5[%c0_6, %c0_7, %c0_8] : memref<1x8x256xf32, #tpu.memory_space<vmem>>, vector<1x8x256xf32>
    %13 = vector.shape_cast %12 : vector<1x8x256xf32> to vector<8x256xf32>
    %14 = vector.shape_cast %11 : vector<8x256xf32> to vector<1x8x256xf32>
    tpu.vector_store %arg5[%c0_6, %c0_7, %c0_8], %14 {strides = array<i32>} : memref<1x8x256xf32, #tpu.memory_space<vmem>>, vector<1x8x256xf32>,
    return
  }
  func.func @transform_0(%arg0: i32, %arg1: i32) -> (i32, i32, i32) {
    %c0_i32 = arith.constant 0 : i32
    %c0_i32_0 = arith.constant 0 : i32
    return %arg0, %arg1, %c0_i32 : i32, i32, i32
  }
  func.func @transform_1(%arg0: i32, %arg1: i32) -> (i32, i32) {
    %c0_i32 = arith.constant 0 : i32
    %c0_i32_0 = arith.constant 0 : i32
    %c0_i32_1 = arith.constant 0 : i32
    return %c0_i32, %c0_i32_0 : i32, i32
  }
  func.func @transform_2(%arg0: i32, %arg1: i32) -> (i32, i32) {
    %c0_i32 = arith.constant 0 : i32
    %c0_i32_0 = arith.constant 0 : i32
    %c0_i32_1 = arith.constant 0 : i32
    return %c0_i32, %c0_i32_0 : i32, i32
  }
  func.func @transform_3(%arg0: i32, %arg1: i32) -> (i32, i32, i32) {
    %c0_i32 = arith.constant 0 : i32
    %c0_i32_0 = arith.constant 0 : i32
    return %arg0, %c0_i32, %arg1 : i32, i32, i32
  }
}

module attributes {stable_mosaic.version = 11 : i64} {
  func.func @_conv_stats_kernel(%arg0: i32, %arg1: i32, %arg2: memref<1x1x18x18x4xf32, #tpu.memory_space<vmem>>, %arg3: memref<36x128xf32, #tpu.memory_space<vmem>>, %arg4: memref<1x256x128xf32, #tpu.memory_space<vmem>>, %arg5: memref<1x1x2x128xf32, #tpu.memory_space<vmem>>) attributes {dimension_semantics = [#tpu.dimension_semantics<parallel>, #tpu.dimension_semantics<parallel>], iteration_bounds = array<i64: 2, 1>, scalar_prefetch = 0 : i64, scratch_operands = 0 : i64, tpu.core_type = #tpu.core_type<tc>, window_params = [{transform_indices = @transform_0, window_bounds = array<i64: 1, 1, 18, 18, 4>}, {pipeline_mode = #tpu.pipeline_mode<synchronous>, transform_indices = @transform_1, window_bounds = array<i64: 36, 128>}, {transform_indices = @transform_2, window_bounds = array<i64: 1, 256, 128>}, {transform_indices = @transform_3, window_bounds = array<i64: 1, 1, 2, 128>}]} {
    %c0 = arith.constant 0 : index
    %c0_0 = arith.constant 0 : index
    %c0_1 = arith.constant 0 : index
    %c0_2 = arith.constant 0 : index
    %c0_3 = arith.constant 0 : index
    %0 = vector.load %arg2[%c0, %c0_0, %c0_1, %c0_2, %c0_3] : memref<1x1x18x18x4xf32, #tpu.memory_space<vmem>>, vector<1x1x16x16x4xf32>
    %1 = vector.shape_cast %0 : vector<1x1x16x16x4xf32> to vector<16x16x4xf32>
    %c0_4 = arith.constant 0 : index
    %c0_5 = arith.constant 0 : index
    %c0_6 = arith.constant 0 : index
    %c1 = arith.constant 1 : index
    %c0_7 = arith.constant 0 : index
    %2 = vector.load %arg2[%c0_4, %c0_5, %c0_6, %c1, %c0_7] : memref<1x1x18x18x4xf32, #tpu.memory_space<vmem>>, vector<1x1x16x16x4xf32>
    %3 = vector.shape_cast %2 : vector<1x1x16x16x4xf32> to vector<16x16x4xf32>
    %c0_8 = arith.constant 0 : index
    %c0_9 = arith.constant 0 : index
    %c0_10 = arith.constant 0 : index
    %c2 = arith.constant 2 : index
    %c0_11 = arith.constant 0 : index
    %4 = vector.load %arg2[%c0_8, %c0_9, %c0_10, %c2, %c0_11] : memref<1x1x18x18x4xf32, #tpu.memory_space<vmem>>, vector<1x1x16x16x4xf32>
    %5 = vector.shape_cast %4 : vector<1x1x16x16x4xf32> to vector<16x16x4xf32>
    %c0_12 = arith.constant 0 : index
    %c0_13 = arith.constant 0 : index
    %c1_14 = arith.constant 1 : index
    %c0_15 = arith.constant 0 : index
    %c0_16 = arith.constant 0 : index
    %6 = vector.load %arg2[%c0_12, %c0_13, %c1_14, %c0_15, %c0_16] : memref<1x1x18x18x4xf32, #tpu.memory_space<vmem>>, vector<1x1x16x16x4xf32>
    %7 = vector.shape_cast %6 : vector<1x1x16x16x4xf32> to vector<16x16x4xf32>
    %c0_17 = arith.constant 0 : index
    %c0_18 = arith.constant 0 : index
    %c1_19 = arith.constant 1 : index
    %c1_20 = arith.constant 1 : index
    %c0_21 = arith.constant 0 : index
    %8 = vector.load %arg2[%c0_17, %c0_18, %c1_19, %c1_20, %c0_21] : memref<1x1x18x18x4xf32, #tpu.memory_space<vmem>>, vector<1x1x16x16x4xf32>
    %9 = vector.shape_cast %8 : vector<1x1x16x16x4xf32> to vector<16x16x4xf32>
    %c0_22 = arith.constant 0 : index
    %c0_23 = arith.constant 0 : index
    %c1_24 = arith.constant 1 : index
    %c2_25 = arith.constant 2 : index
    %c0_26 = arith.constant 0 : index
    %10 = vector.load %arg2[%c0_22, %c0_23, %c1_24, %c2_25, %c0_26] : memref<1x1x18x18x4xf32, #tpu.memory_space<vmem>>, vector<1x1x16x16x4xf32>
    %11 = vector.shape_cast %10 : vector<1x1x16x16x4xf32> to vector<16x16x4xf32>
    %c0_27 = arith.constant 0 : index
    %c0_28 = arith.constant 0 : index
    %c2_29 = arith.constant 2 : index
    %c0_30 = arith.constant 0 : index
    %c0_31 = arith.constant 0 : index
    %12 = vector.load %arg2[%c0_27, %c0_28, %c2_29, %c0_30, %c0_31] : memref<1x1x18x18x4xf32, #tpu.memory_space<vmem>>, vector<1x1x16x16x4xf32>
    %13 = vector.shape_cast %12 : vector<1x1x16x16x4xf32> to vector<16x16x4xf32>
    %c0_32 = arith.constant 0 : index
    %c0_33 = arith.constant 0 : index
    %c2_34 = arith.constant 2 : index
    %c1_35 = arith.constant 1 : index
    %c0_36 = arith.constant 0 : index
    %14 = vector.load %arg2[%c0_32, %c0_33, %c2_34, %c1_35, %c0_36] : memref<1x1x18x18x4xf32, #tpu.memory_space<vmem>>, vector<1x1x16x16x4xf32>
    %15 = vector.shape_cast %14 : vector<1x1x16x16x4xf32> to vector<16x16x4xf32>
    %c0_37 = arith.constant 0 : index
    %c0_38 = arith.constant 0 : index
    %c2_39 = arith.constant 2 : index
    %c2_40 = arith.constant 2 : index
    %c0_41 = arith.constant 0 : index
    %16 = vector.load %arg2[%c0_37, %c0_38, %c2_39, %c2_40, %c0_41] : memref<1x1x18x18x4xf32, #tpu.memory_space<vmem>>, vector<1x1x16x16x4xf32>
    %17 = vector.shape_cast %16 : vector<1x1x16x16x4xf32> to vector<16x16x4xf32>
    %18 = tpu.concatenate %1, %3, %5, %7, %9, %11, %13, %15, %17 in 2 : vector<16x16x4xf32>, vector<16x16x4xf32>, vector<16x16x4xf32>, vector<16x16x4xf32>, vector<16x16x4xf32>, vector<16x16x4xf32>, vector<16x16x4xf32>, vector<16x16x4xf32>, vector<16x16x4xf32> -> vector<16x16x36xf32>
    %19 = vector.shape_cast %18 : vector<16x16x36xf32> to vector<256x36xf32>
    %c0_42 = arith.constant 0 : index
    %c0_43 = arith.constant 0 : index
    %20 = vector.load %arg3[%c0_42, %c0_43] : memref<36x128xf32, #tpu.memory_space<vmem>>, vector<36x128xf32>
    %cst = arith.constant dense<0.000000e+00> : vector<256x128xf32>
    %21 = tpu.matmul %19, %20, %cst {dimension_numbers = #tpu.dot_dimension_numbers<[1], [0], [0], [1], [0, 0, 1, 1], [], []>} : vector<256x36xf32>, vector<36x128xf32>, vector<256x128xf32> -> vector<256x128xf32>
    %c0_44 = arith.constant 0 : index
    %c0_45 = arith.constant 0 : index
    %c0_46 = arith.constant 0 : index
    %22 = vector.load %arg4[%c0_44, %c0_45, %c0_46] : memref<1x256x128xf32, #tpu.memory_space<vmem>>, vector<1x256x128xf32>
    %23 = vector.shape_cast %22 : vector<1x256x128xf32> to vector<256x128xf32>
    %24 = vector.shape_cast %21 : vector<256x128xf32> to vector<1x256x128xf32>
    tpu.vector_store %arg4[%c0_44, %c0_45, %c0_46], %24 {strides = array<i32>} : memref<1x256x128xf32, #tpu.memory_space<vmem>>, vector<1x256x128xf32>,
    %cst_47 = arith.constant dense<0.000000e+00> : vector<128xf32>
    %25 = vector.multi_reduction <add>, %21, %cst_47 [0] : vector<256x128xf32> to vector<128xf32>
    %26 = vector.shape_cast %25 : vector<128xf32> to vector<1x128xf32>
    %cst_48 = arith.constant 3.906250e-03 : f32
    %27 = vector.broadcast %cst_48 : f32 to vector<1x128xf32>
    %28 = arith.mulf %26, %27 : vector<1x128xf32>
    %29 = vector.broadcast %28 : vector<1x128xf32> to vector<256x128xf32>
    %30 = arith.subf %21, %29 : vector<256x128xf32>
    %31 = arith.mulf %30, %30 : vector<256x128xf32>
    %cst_49 = arith.constant dense<0.000000e+00> : vector<128xf32>
    %32 = vector.multi_reduction <add>, %31, %cst_49 [0] : vector<256x128xf32> to vector<128xf32>
    %33 = vector.shape_cast %32 : vector<128xf32> to vector<1x128xf32>
    %34 = tpu.concatenate %26, %33 in 0 : vector<1x128xf32>, vector<1x128xf32> -> vector<2x128xf32>
    %c0_50 = arith.constant 0 : index
    %c0_51 = arith.constant 0 : index
    %c0_52 = arith.constant 0 : index
    %c0_53 = arith.constant 0 : index
    %35 = vector.load %arg5[%c0_50, %c0_51, %c0_52, %c0_53] : memref<1x1x2x128xf32, #tpu.memory_space<vmem>>, vector<1x1x2x128xf32>
    %36 = vector.shape_cast %35 : vector<1x1x2x128xf32> to vector<2x128xf32>
    %37 = vector.shape_cast %34 : vector<2x128xf32> to vector<1x1x2x128xf32>
    tpu.vector_store %arg5[%c0_50, %c0_51, %c0_52, %c0_53], %37 {strides = array<i32>} : memref<1x1x2x128xf32, #tpu.memory_space<vmem>>, vector<1x1x2x128xf32>,
    return
  }
  func.func @transform_0(%arg0: i32, %arg1: i32) -> (i32, i32, i32, i32, i32) {
    %c0_i32 = arith.constant 0 : i32
    %c0_i32_0 = arith.constant 0 : i32
    %c0_i32_1 = arith.constant 0 : i32
    %c0_i32_2 = arith.constant 0 : i32
    return %arg0, %arg1, %c0_i32, %c0_i32_0, %c0_i32_1 : i32, i32, i32, i32, i32
  }
  func.func @transform_1(%arg0: i32, %arg1: i32) -> (i32, i32) {
    %c0_i32 = arith.constant 0 : i32
    %c0_i32_0 = arith.constant 0 : i32
    %c0_i32_1 = arith.constant 0 : i32
    return %c0_i32, %c0_i32_0 : i32, i32
  }
  func.func @transform_2(%arg0: i32, %arg1: i32) -> (i32, i32, i32) {
    %c0_i32 = arith.constant 0 : i32
    %c0_i32_0 = arith.constant 0 : i32
    return %arg0, %arg1, %c0_i32 : i32, i32, i32
  }
  func.func @transform_3(%arg0: i32, %arg1: i32) -> (i32, i32, i32, i32) {
    %c0_i32 = arith.constant 0 : i32
    %c0_i32_0 = arith.constant 0 : i32
    %c0_i32_1 = arith.constant 0 : i32
    return %arg0, %arg1, %c0_i32, %c0_i32_0 : i32, i32, i32, i32
  }
}

</mosaic_0001>

<bundles_post_ra>
// kernel: conv_block_forward.3
= control target key start
LH: loop header
LB: loop body
LE: loop exit
PB: predicated region body
PF: predicated region fallthrough
CT: control target
= control target key end

     0   :  { %s588_s12 = smov 0   ;;  %s590_s13 = smov 0   ;;  %s733_s0 = inlined_call_operand.vmem [shape: f32[2,256,128], index: 0, kind: input, shape index: {}]   ;;  %s734_s1 = inlined_call_operand.vmem [shape: f32[1,128], index: 1, kind: input, shape index: {}]   ;;  %s735_s2 = inlined_call_operand.vmem [shape: f32[1,128], index: 2, kind: input, shape index: {}]   ;;  %s736_s3 = inlined_call_operand.vmem [shape: f32[2,8,256], index: 3, kind: output, shape index: {}]  }
   0x1   :  { %s592_s14 = smov 0  }
   0x2 LB: > { %s25_s15 = sadd.s32 1, %s562_s13  ;;  %p509_p0 = scmp.ge.s32.totalorder %s566_s14, 1  ;;  %s566_s14 = sphi %s592_s14, %s13_s14   ;;  %s562_s13 = sphi %s590_s13, %s738_s13   ;;  %s558_s12 = sphi %s588_s12, %s737_s12  }
   0x3   : > { %p27_p1 = scmp.ge.s32.totalorder %s25_s15, 2  ;;  %p158_p2 = scmp.lt.s32.totalorder %s566_s14, 3 }
   0x5   : > { %s740_s15 = smov (%p27_p1, %s25_s15), 0  ;;  %p159_p3 = pnand %p509_p0, %p158_p2 }
   0x6   : > { %p191_p4 = scmp.lt.s32.totalorder (!%p159_p3), %s558_s12, 1  ;;  %v612_v0 = vld [vmem:[%s734_s1] ss:$0 sm:$0xff] (!%p159_p3) }
   0x7   : > { %162 = sbr.rel (%p159_p3) target bundleno = 155 (0x9b), region = 32  ;;  %v622_v1 = vld [vmem:[%s735_s2] ss:$0 sm:$0xff] (!%p159_p3) }
   0xe   : > { %s742_s12 = smov (!%p191_p4, %s558_s12), 1 }
   0xf   : > { %s518_s16 = sshll.u32 %s742_s12, 8  ;;  %s519_s24 = sshll.u32 %s742_s12, 4 }
  0x10   : > { %s617_s21 = scalar_lea.vmem %s733_s0, %s518_s16  ;;  %s208_s27 = scalar_lea.vmem %s736_s3, %s519_s24 }
  0x11   : > { %v226_v2 = vld [vmem:[%s617_s21 + $0x80] sm:$0xff]  ;;  %v227_v4 = vld [vmem:[%s617_s21 + $0x88] sm:$0xff]  ;;  %v228_v9 = vld [vmem:[%s617_s21 + $0x90] sm:$0xff] }
  0x12   : > { %v210_v3 = vld [vmem:[%s617_s21] sm:$0xff]  ;;  %v265_v5 = vmul.f32 %v612_v0, %v226_v2  ;;  %v266_v7 = vmul.f32 %v612_v0, %v227_v4  ;;  %v211_v8 = vld [vmem:[%s617_s21 + $0x8] sm:$0xff]  ;;  %v212_v10 = vld [vmem:[%s617_s21 + $0x10] sm:$0xff]  ;;  %v267_v12 = vmul.f32 %v612_v0, %v228_v9 }
  0x13   : > { %v249_v6 = vmul.f32 %v612_v0, %v210_v3  ;;  %v250_v11 = vmul.f32 %v612_v0, %v211_v8  ;;  %v251_v16 = vmul.f32 %v612_v0, %v212_v10  ;;  %v229_v17 = vld [vmem:[%s617_s21 + $0x98] sm:$0xff]  ;;  %v230_v28 = vld [vmem:[%s617_s21 + $0xa0] sm:$0xff]  ;;  %v231_v36 = vld [vmem:[%s617_s21 + $0xa8] sm:$0xff] }
  0x14   : > { %v304_v13 = vadd.f32 %v622_v1, %v265_v5  ;;  %v305_v15 = vadd.f32 %v622_v1, %v266_v7  ;;  %v213_v19 = vld [vmem:[%s617_s21 + $0x18] sm:$0xff]  ;;  %v306_v22 = vadd.f32 %v622_v1, %v267_v12  ;;  %v268_v23 = vmul.f32 %v612_v0, %v229_v17  ;;  %v214_v29 = vld [vmem:[%s617_s21 + $0x20] sm:$0xff]  ;;  %v215_v37 = vld [vmem:[%s617_s21 + $0x28] sm:$0xff] }
  0x15   : > { %v288_v14 = vadd.f32 %v622_v1, %v249_v6  ;;  %v289_v18 = vadd.f32 %v622_v1, %v250_v11  ;;  %v290_v26 = vadd.f32 %v622_v1, %v251_v16  ;;  %v252_v27 = vmul.f32 %v612_v0, %v213_v19  ;;  %v232_v44 = vld [vmem:[%s617_s21 + $0xb0] sm:$0xff]  ;;  %v233_v52 = vld [vmem:[%s617_s21 + $0xb8] sm:$0xff]  ;;  %v234_v60 = vld [vmem:[%s617_s21 + $0xc0] sm:$0xff] }
  0x16   : > { %v336_v20 = vmax.f32 %v304_v13, 0.0  ;;  %v337_v24 = vmax.f32 %v305_v15, 0.0  ;;  %v338_v30 = vmax.f32 %v306_v22, 0.0  ;;  %v307_v31 = vadd.f32 %v622_v1, %v268_v23  ;;  %v216_v45 = vld [vmem:[%s617_s21 + $0x30] sm:$0xff]  ;;  %v217_v53 = vld [vmem:[%s617_s21 + $0x38] sm:$0xff]  ;;  %v218_v61 = vld [vmem:[%s617_s21 + $0x40] sm:$0xff] }
  0x17   : > { %v320_v21 = vmax.f32 %v288_v14, 0.0  ;;  %v321_v25 = vmax.f32 %v289_v18, 0.0  ;;  %v322_v32 = vmax.f32 %v290_v26, 0.0  ;;  %v291_v33 = vadd.f32 %v622_v1, %v252_v27  ;;  %v235_v6 = vld [vmem:[%s617_s21 + $0xc8] sm:$0xff]  ;;  %v236_v14 = vld [vmem:[%s617_s21 + $0xd0] sm:$0xff]  ;;  %v237_v22 = vld [vmem:[%s617_s21 + $0xd8] sm:$0xff] }
  0x18   : > { %384 = vxpose.xlu1.b32.start [1/16] (narrow) %v336_v20, 8  ;;  %v269_v34 = vmul.f32 %v612_v0, %v230_v28  ;;  %v253_v35 = vmul.f32 %v612_v0, %v214_v29  ;;  %v339_v38 = vmax.f32 %v307_v31, 0.0  ;;  %v270_v39 = vmul.f32 %v612_v0, %v231_v36  ;;  %v219_v7 = vld [vmem:[%s617_s21 + $0x48] sm:$0xff]  ;;  %v220_v15 = vld [vmem:[%s617_s21 + $0x50] sm:$0xff]  ;;  %v221_v23 = vld [vmem:[%s617_s21 + $0x58] sm:$0xff] }
  0x19   : > { %352 = vxpose.xlu0.b32.start [1/16] (narrow) %v320_v21, 8  ;;  %v323_v40 = vmax.f32 %v291_v33, 0.0  ;;  %v254_v43 = vmul.f32 %v612_v0, %v215_v37  ;;  %v271_v46 = vmul.f32 %v612_v0, %v232_v44  ;;  %v255_v47 = vmul.f32 %v612_v0, %v216_v45  ;;  %v222_v31 = vld [vmem:[%s617_s21 + $0x60] sm:$0xff] }
  0x1a   : > { %v308_v41 = vadd.f32 %v622_v1, %v269_v34  ;;  %v292_v42 = vadd.f32 %v622_v1, %v253_v35  ;;  %v309_v50 = vadd.f32 %v622_v1, %v270_v39  ;;  %v272_v55 = vmul.f32 %v612_v0, %v233_v52  ;;  %v223_v39 = vld [vmem:[%s617_s21 + $0x68] sm:$0xff] }
  0x1b   : > { %v293_v51 = vadd.f32 %v622_v1, %v254_v43  ;;  %v310_v54 = vadd.f32 %v622_v1, %v271_v46  ;;  %v294_v58 = vadd.f32 %v622_v1, %v255_v47  ;;  %v256_v59 = vmul.f32 %v612_v0, %v217_v53  ;;  %v240_v46 = vld [vmem:[%s617_s21 + $0xf0] sm:$0xff] }
  0x1c   : > { %385 = vxpose.xlu1.b32.cont [2/16] (narrow) %v337_v24, 8  ;;  %v340_v48 = vmax.f32 %v308_v41, 0.0  ;;  %v324_v49 = vmax.f32 %v292_v42, 0.0  ;;  %v341_v56 = vmax.f32 %v309_v50, 0.0  ;;  %v311_v63 = vadd.f32 %v622_v1, %v272_v55  ;;  %v224_v47 = vld [vmem:[%s617_s21 + $0x70] sm:$0xff]  ;;  %v225_v55 = vld [vmem:[%s617_s21 + $0x78] sm:$0xff] }
  0x1d   : > { %353 = vxpose.xlu0.b32.cont [2/16] (narrow) %v321_v25, 8  ;;  %v325_v57 = vmax.f32 %v293_v51, 0.0  ;;  %v342_v62 = vmax.f32 %v310_v54, 0.0  ;;  %v326_v2 = vmax.f32 %v294_v58, 0.0  ;;  %v295_v3 = vadd.f32 %v622_v1, %v256_v59  ;;  %v241_v54 = vld [vmem:[%s617_s21 + $0xf8] sm:$0xff] }
  0x1e   : > { %v273_v4 = vmul.f32 %v612_v0, %v234_v60  ;;  %v257_v5 = vmul.f32 %v612_v0, %v218_v61  ;;  %v343_v8 = vmax.f32 %v311_v63, 0.0  ;;  %v274_v9 = vmul.f32 %v612_v0, %v235_v6 }
  0x1f   : > { %v327_v10 = vmax.f32 %v295_v3, 0.0  ;;  %v258_v13 = vmul.f32 %v612_v0, %v219_v7  ;;  %v275_v16 = vmul.f32 %v612_v0, %v236_v14  ;;  %v259_v17 = vmul.f32 %v612_v0, %v220_v15 }
  0x20   : > { %386 = vxpose.xlu1.b32.cont [3/16] (narrow) %v338_v30, 8  ;;  %v312_v11 = vadd.f32 %v622_v1, %v273_v4  ;;  %v296_v12 = vadd.f32 %v622_v1, %v257_v5  ;;  %v313_v20 = vadd.f32 %v622_v1, %v274_v9  ;;  %v276_v25 = vmul.f32 %v612_v0, %v237_v22  ;;  %v238_v30 = vld [vmem:[%s617_s21 + $0xe0] sm:$0xff] }
  0x21   : > { %354 = vxpose.xlu0.b32.cont [3/16] (narrow) %v322_v32, 8  ;;  %v297_v21 = vadd.f32 %v622_v1, %v258_v13  ;;  %v314_v24 = vadd.f32 %v622_v1, %v275_v16  ;;  %v298_v28 = vadd.f32 %v622_v1, %v259_v17  ;;  %v260_v29 = vmul.f32 %v612_v0, %v221_v23 }
  0x22   : > { %v344_v18 = vmax.f32 %v312_v11, 0.0  ;;  %v328_v19 = vmax.f32 %v296_v12, 0.0  ;;  %v345_v26 = vmax.f32 %v313_v20, 0.0  ;;  %v315_v33 = vadd.f32 %v622_v1, %v276_v25 }
  0x23   : > { %v329_v27 = vmax.f32 %v297_v21, 0.0  ;;  %v346_v32 = vmax.f32 %v314_v24, 0.0  ;;  %v330_v34 = vmax.f32 %v298_v28, 0.0  ;;  %v299_v35 = vadd.f32 %v622_v1, %v260_v29 }
  0x24   : > { %387 = vxpose.xlu1.b32.cont [4/16] (narrow) %v339_v38, 8  ;;  %v277_v36 = vmul.f32 %v612_v0, %v238_v30  ;;  %v261_v37 = vmul.f32 %v612_v0, %v222_v31  ;;  %v239_v38 = vld [vmem:[%s617_s21 + $0xe8] sm:$0xff]  ;;  %v262_v45 = vmul.f32 %v612_v0, %v223_v39  ;;  %v264_v61 = vmul.f32 %v612_v0, %v225_v55 }
  0x25   : > { %355 = vxpose.xlu0.b32.cont [4/16] (narrow) %v323_v40, 8  ;;  %v347_v40 = vmax.f32 %v315_v33, 0.0  ;;  %v278_v41 = vmul.f32 %v612_v0, %v239_v38  ;;  %v331_v42 = vmax.f32 %v299_v35, 0.0 }
  0x26   : > { %v316_v43 = vadd.f32 %v622_v1, %v277_v36  ;;  %v300_v44 = vadd.f32 %v622_v1, %v261_v37  ;;  %v301_v53 = vadd.f32 %v622_v1, %v262_v45  ;;  %v303_v3 = vadd.f32 %v622_v1, %v264_v61 }
  0x27   : > { %v317_v52 = vadd.f32 %v622_v1, %v278_v41 }
  0x28   : > { %388 = vxpose.xlu1.b32.cont [5/16] (narrow) %v340_v48, 8  ;;  %v279_v48 = vmul.f32 %v612_v0, %v240_v46  ;;  %v348_v50 = vmax.f32 %v316_v43, 0.0  ;;  %v332_v51 = vmax.f32 %v300_v44, 0.0  ;;  %v333_v59 = vmax.f32 %v301_v53, 0.0 }
  0x29   : > { %356 = vxpose.xlu0.b32.cont [5/16] (narrow) %v324_v49, 8  ;;  %v263_v49 = vmul.f32 %v612_v0, %v224_v47  ;;  %v349_v58 = vmax.f32 %v317_v52, 0.0  ;;  %v335_v5 = vmax.f32 %v303_v3, 0.0 }
  0x2b   : > { %v302_v60 = vadd.f32 %v622_v1, %v263_v49 }
  0x2c   : > { %389 = vxpose.xlu1.b32.cont [6/16] (narrow) %v341_v56, 8  ;;  %v318_v56 = vadd.f32 %v622_v1, %v279_v48 }
  0x2d   : > { %357 = vxpose.xlu0.b32.cont [6/16] (narrow) %v325_v57, 8  ;;  %v280_v57 = vmul.f32 %v612_v0, %v241_v54  ;;  %v334_v63 = vmax.f32 %v302_v60, 0.0 }
  0x30   : > { %390 = vxpose.xlu1.b32.cont [7/16] (narrow) %v342_v62, 8  ;;  %v350_v62 = vmax.f32 %v318_v56, 0.0 }
  0x31   : > { %358 = vxpose.xlu0.b32.cont [7/16] (narrow) %v326_v2, 8  ;;  %v319_v2 = vadd.f32 %v622_v1, %v280_v57 }
  0x33   : > { %v351_v4 = vmax.f32 %v319_v2, 0.0 }
  0x34   : > { %391 = vxpose.xlu1.b32.cont [8/16] (narrow) %v343_v8, 8 }
  0x35   : > { %359 = vxpose.xlu0.b32.cont [8/16] (narrow) %v327_v10, 8 }
  0x38   : > { %392 = vxpose.xlu1.b32.cont [9/16] (narrow) %v344_v18, 8 }
  0x39   : > { %360 = vxpose.xlu0.b32.cont [9/16] (narrow) %v328_v19, 8 }
  0x3c   : > { %393 = vxpose.xlu1.b32.cont [10/16] (narrow) %v345_v26, 8 }
  0x3d   : > { %361 = vxpose.xlu0.b32.cont [10/16] (narrow) %v329_v27, 8 }
  0x40   : > { %394 = vxpose.xlu1.b32.cont [11/16] (narrow) %v346_v32, 8 }
  0x41   : > { %362 = vxpose.xlu0.b32.cont [11/16] (narrow) %v330_v34, 8 }
  0x44   : > { %395 = vxpose.xlu1.b32.cont [12/16] (narrow) %v347_v40, 8 }
  0x45   : > { %363 = vxpose.xlu0.b32.cont [12/16] (narrow) %v331_v42, 8 }
  0x48   : > { %396 = vxpose.xlu1.b32.cont [13/16] (narrow) %v348_v50, 8 }
  0x49   : > { %364 = vxpose.xlu0.b32.cont [13/16] (narrow) %v332_v51, 8 }
  0x4c   : > { %397 = vxpose.xlu1.b32.cont [14/16] (narrow) %v349_v58, 8 }
  0x4d   : > { %365 = vxpose.xlu0.b32.cont [14/16] (narrow) %v333_v59, 8 }
  0x50   : > { %398 = vxpose.xlu1.b32.cont [15/16] (narrow) %v350_v62, 8 }
  0x51   : > { %366 = vxpose.xlu0.b32.cont [15/16] (narrow) %v334_v63, 8 }
  0x54   : > { %399 = vxpose.xlu1.b32.end [16/16] (narrow) %v351_v4, 8 }
  0x55   : > { %367 = vxpose.xlu0.b32.end [16/16] (narrow) %v335_v5, 8 }
  0x98   : > { %v400_v0 = vpop.trf.xlu1 }
  0x99   : > { %v368_v6 = vpop.trf.xlu0  ;;  %417 = vst [vmem:[%s208_s27 + $0x8] sm:$0xff] %v400_v0 }
  0x9a   : > { %416 = vst [vmem:[%s208_s27] sm:$0xff] %v368_v6 }
  0x9b PF: > { %s13_s14 = sadd.s32 1, %s566_s14   ;;  %s737_s12 = smov %s562_s13 }
  0x9c   : > { %p10_p5 = scmp.ge.s32.totalorder %s13_s14, 4   ;;  %s738_s13 = smov %s740_s15 }
  0x9e   :  { %12 = sbr.rel (!%p10_p5) target bundleno = 2 (0x2), region = 62 }

// kernel: conv_block_forward.2
= control target key start
LH: loop header
LB: loop body
LE: loop exit
PB: predicated region body
PF: predicated region fallthrough
CT: control target
= control target key end

     0   :  { %s2872_s12 = smov 0   ;;  %s2874_s13 = smov 0   ;;  %s4249_s0 = inlined_call_operand.vmem [shape: f32[2,1,18,18,4], index: 0, kind: input, shape index: {}]   ;;  %s4250_s1 = inlined_call_operand.vmem [shape: f32[36,128], index: 1, kind: input, shape index: {}]   ;;  %s4251_s2 = inlined_call_operand.vmem [shape: f32[2,256,128], index: 2, kind: output, shape index: {0}]   ;;  %s4252_s3 = inlined_call_operand.vmem [shape: f32[2,1,2,128], index: 3, kind: output, shape index: {1}]  }
   0x1   :  { %s2876_s14 = smov 0  }
   0x2 LB: > { %s26_s15 = sadd.s32 1, %s2838_s13  ;;  %p2445_p0 = scmp.ge.s32.totalorder %s2842_s14, 1  ;;  %s2842_s14 = sphi %s2876_s14, %s14_s14   ;;  %s2838_s13 = sphi %s2874_s13, %s4270_s13   ;;  %s2834_s12 = sphi %s2872_s12, %s4269_s12  }
   0x3   : > { %p28_p1 = scmp.ge.s32.totalorder %s26_s15, 2  ;;  %p162_p2 = scmp.lt.s32.totalorder %s2842_s14, 3 }
   0x5   : > { %s4272_s15 = smov (%p28_p1, %s26_s15), 0  ;;  %p163_p3 = pnand %p2445_p0, %p162_p2 }
   0x7   : > { %166 = sbr.rel (%p163_p3) target bundleno = 957 (0x3bd), region = 28 }
   0xe   : > { %p201_p4 = scmp.lt.s32.totalorder %s2834_s12, 1  ;;  %s2844_s20 = smov 4   ;;  %v1805_v41 = vld [vmem:[%s4250_s1] sm:$0xff]  ;;  %v1806_v42 = vld [vmem:[%s4250_s1 + $0x8] sm:$0xff]  ;;  %v1807_v45 = vld [vmem:[%s4250_s1 + $0x10] sm:$0xff]  ;;  %vm1907_vm0 = vcmask 1043456  }
   0xf   : > { %s2845_s21 = smov 8   ;;  %s2846_s22 = smov 12   ;;  %v2773_v43 = vpack.c.bf16 %v1806_v42, %v1805_v41  ;;  %v1808_v46 = vld [vmem:[%s4250_s1 + $0x18] sm:$0xff]  ;;  %v1809_v49 = vld [vmem:[%s4250_s1 + $0x20] sm:$0xf]  ;;  %vm1541_vm1 = vcmask 31744  }
  0x10   : > { %s4274_s12 = smov (!%p201_p4, %s2834_s12), 1  ;;  %s2847_s23 = smov 16   ;;  %v2777_v47 = vpack.c.bf16 %v1808_v46, %v1807_v45  ;;  %vm1574_vm2 = vcmask 64512   ;;  %vm1607_vm3 = vcmask 97280   ;;  %vm1640_vm4 = vcmask 130048  }
  0x11   : > { %s2787_s16 = smul.u32 432, %s4274_s12  ;;  %s2848_s28 = smov 20   ;;  %2774 = vmatprep.subr.bf16.mxu0 %v2773_v43  ;;  %2781 = vmatprep.subr.bf16.mxu1 %v2773_v43  ;;  %vm1673_vm5 = vcmask 162816   ;;  %vm1706_vm6 = vcmask 195584   ;;  %vm1739_vm7 = vcmask 228352   ;;  %vm1772_vm8 = vcmask 261120  }
  0x12   : > { %2776 = vmatpush3.bf16.msra.mxu0 %v2773_v43  ;;  %2784 = vmatpush3.bf16.msra.mxu1 %v2773_v43  ;;  %s2849_s6 = smov 24   ;;  %s2850_s9 = smov 28   ;;  %vm1810_vm9 = vcmask 293888   ;;  %vm2307_vm10 = vcmask 1040384  }
  0x13   : > { %s2896_s19 = scalar_lea.vmem %s4249_s0, %s2787_s16  ;;  %2778 = vmatprep.subr.bf16.mxu0 %v2777_v47  ;;  %2782 = vmatprep.subr.bf16.mxu1 %v2777_v47  ;;  %s2851_s10 = smov 32  }
  0x14   : > { %v2899_v0 = vld [vmem:[%s2896_s19 + $0x19] sm:$0xff]  ;;  %v259_v1 = vld [vmem:[%s2896_s19 + $0x1] sm:$0xff]  ;;  %v260_v3 = vld [vmem:[%s2896_s19 + $0x9] sm:$0xff]  ;;  %s2677_s11 = sshll.u32 %s4274_s12, 8 }
  0x15   : > { %553 = vrot.lane.b32.xlu1 %v2899_v0, %s2844_s20  ;;  %549 = vrot.lane.b32.xlu0 %v259_v1, %s2844_s20  ;;  %v2906_v2 = vld [vmem:[%s2896_s19 + $0x21] sm:$0xff]  ;;  %v2913_v4 = vld [vmem:[%s2896_s19 + $0x39] sm:$0xff]  ;;  %s3744_s18 = scalar_lea.vmem %s4251_s2, %s2677_s11 }
  0x16   : > { %v2916_v5 = vld [vmem:[%s2896_s19 + $0x31] sm:$0xff]  ;;  %v2926_v7 = vld [vmem:[%s2896_s19 + $0x49] sm:$0xff]  ;;  %v2936_v9 = vld [vmem:[%s2896_s19 + $0x61] sm:$0xff]  ;;  %2780 = vmatpush3.bf16.msra.mxu0 %v2777_v47  ;;  %2785 = vmatpush3.bf16.msra.mxu1 %v2777_v47 }
  0x17   : > { %v2923_v6 = vld [vmem:[%s2896_s19 + $0x51] sm:$0xff]  ;;  %v2933_v8 = vld [vmem:[%s2896_s19 + $0x69] sm:$0xff]  ;;  %v2943_v10 = vld [vmem:[%s2896_s19 + $0x81] sm:$0xff]  ;;  %2723 = vmatprep.subr.msk.mxu0 %vm1907_vm0, %v1809_v49  ;;  %2783 = vmatprep.subr.msk.mxu1 %vm1907_vm0, %v1809_v49 }
  0x18   : > { %v2946_v11 = vld [vmem:[%s2896_s19 + $0x79] sm:$0xff]  ;;  %v2956_v13 = vld [vmem:[%s2896_s19 + $0x91] sm:$0xff]  ;;  %v2966_v15 = vld [vmem:[%s2896_s19 + $0xa9] sm:$0xff] }
  0x19   : > { %555 = vrot.lane.b32.xlu1 %v2906_v2, %s2844_s20  ;;  %551 = vrot.lane.b32.xlu0 %v260_v3, %s2844_s20  ;;  %v2953_v12 = vld [vmem:[%s2896_s19 + $0x99] sm:$0xff]  ;;  %v2963_v14 = vld [vmem:[%s2896_s19 + $0xb1] sm:$0xff] }
  0x1a   : > { %v2973_v16 = vld [vmem:[%s2896_s19 + $0xc9] sm:$0xff]  ;;  %v2976_v17 = vld [vmem:[%s2896_s19 + $0xc1] sm:$0xff]  ;;  %v2986_v19 = vld [vmem:[%s2896_s19 + $0xd9] sm:$0xff]  ;;  %2724 = vmatpush3.msk.msra.mxu0 %vm1907_vm0, %v1809_v49  ;;  %2786 = vmatpush3.msk.msra.mxu1 %vm1907_vm0, %v1809_v49 }
  0x1b   : > { %v2983_v18 = vld [vmem:[%s2896_s19 + $0xe1] sm:$0xff]  ;;  %v280_v20 = vld [vmem:[%s2896_s19 + $0xf9] sm:$0xff]  ;;  %v279_v21 = vld [vmem:[%s2896_s19 + $0xf1] sm:$0xff] }
  0x1c   : > { %v282_v22 = vld [vmem:[%s2896_s19 + $0x111] sm:$0xff]  ;;  %v281_v23 = vld [vmem:[%s2896_s19 + $0x109] sm:$0xff]  ;;  %v283_v25 = vld [vmem:[%s2896_s19 + $0x121] sm:$0xff] }
  0x1d   : > { %559 = vrot.lane.b32.xlu1 %v2913_v4, %s2844_s20  ;;  %557 = vrot.lane.b32.xlu0 %v2916_v5, %s2844_s20  ;;  %v284_v24 = vld [vmem:[%s2896_s19 + $0x129] sm:$0xff]  ;;  %v286_v26 = vld [vmem:[%s2896_s19 + $0x141] sm:$0xff] }
  0x1e   : > { %v285_v27 = vld [vmem:[%s2896_s19 + $0x139] sm:$0xff]  ;;  %v287_v29 = vld [vmem:[%s2896_s19 + $0x151] sm:$0xff]  ;;  %v289_v31 = vld [vmem:[%s2896_s19 + $0x169] sm:$0xff] }
  0x1f   : > { %v288_v28 = vld [vmem:[%s2896_s19 + $0x159] sm:$0xff]  ;;  %v290_v30 = vld [vmem:[%s2896_s19 + $0x171] sm:$0xff]  ;;  %v291_v33 = vld [vmem:[%s2896_s19 + $0x2] sm:$0xff] }
  0x20   : > { %v292_v32 = vld [vmem:[%s2896_s19 + $0xa] sm:$0xff]  ;;  %v294_v34 = vld [vmem:[%s2896_s19 + $0x22] sm:$0xff]  ;;  %v293_v35 = vld [vmem:[%s2896_s19 + $0x1a] sm:$0xff] }
  0x21   : > { %563 = vrot.lane.b32.xlu1 %v2923_v6, %s2844_s20  ;;  %561 = vrot.lane.b32.xlu0 %v2926_v7, %s2844_s20  ;;  %v296_v36 = vld [vmem:[%s2896_s19 + $0x3a] sm:$0xff]  ;;  %v295_v37 = vld [vmem:[%s2896_s19 + $0x32] sm:$0xff] }
  0x22   : > { %v3029_v38 = vld [vmem:[%s2896_s19 + $0x18] sm:$0xff]  ;;  %v3032_v39 = vld [vmem:[%s2896_s19 + $0x4a] sm:$0xff]  ;;  %v3039_v40 = vld [vmem:[%s2896_s19 + $0x20] sm:$0xff] }
  0x23   : > { %v3055_v44 = vld [vmem:[%s2896_s19 + $0x30] sm:$0xff]  ;;  %v3067_v48 = vld [vmem:[%s2896_s19 + $0x38] sm:$0xff]  ;;  %v2548_v50 = vld [vmem:[%s2896_s19 + $0x48] sm:$0xff] }
  0x24   : > { %v2549_v51 = vld [vmem:[%s2896_s19 + $0x50] sm:$0xff]  ;;  %v236_v62 = vld [vmem:[%s2896_s19 + $0x68] sm:$0xff]  ;;  %v235_v63 = vld [vmem:[%s2896_s19 + $0x60] sm:$0xff] }
  0x25   : > { %567 = vrot.lane.b32.xlu1 %v2933_v8, %s2844_s20  ;;  %565 = vrot.lane.b32.xlu0 %v2936_v9, %s2844_s20  ;;  %v2616_v49 = vld [vmem:[%s2896_s19 + $0x7a] sm:$0xff] }
  0x29   : > { %571 = vrot.lane.b32.xlu1 %v2943_v10, %s2844_s20  ;;  %569 = vrot.lane.b32.xlu0 %v2946_v11, %s2844_s20 }
  0x2d   : > { %575 = vrot.lane.b32.xlu1 %v2953_v12, %s2844_s20  ;;  %573 = vrot.lane.b32.xlu0 %v2956_v13, %s2844_s20 }
  0x31   : > { %579 = vrot.lane.b32.xlu1 %v2963_v14, %s2844_s20  ;;  %577 = vrot.lane.b32.xlu0 %v2966_v15, %s2844_s20 }
  0x35   : > { %583 = vrot.lane.b32.xlu1 %v2973_v16, %s2844_s20  ;;  %581 = vrot.lane.b32.xlu0 %v2976_v17, %s2844_s20 }
  0x39   : > { %587 = vrot.lane.b32.xlu1 %v2983_v18, %s2844_s20  ;;  %585 = vrot.lane.b32.xlu0 %v2986_v19, %s2844_s20 }
  0x3d   : > { %591 = vrot.lane.b32.xlu1 %v280_v20, %s2844_s20  ;;  %589 = vrot.lane.b32.xlu0 %v279_v21, %s2844_s20 }
  0x41   : > { %595 = vrot.lane.b32.xlu1 %v282_v22, %s2844_s20  ;;  %593 = vrot.lane.b32.xlu0 %v281_v23, %s2844_s20  ;;  %v3147_v23 = vld [vmem:[%s2896_s19 + $0x90] sm:$0xff] }
  0x45   : > { %599 = vrot.lane.b32.xlu1 %v284_v24, %s2844_s20  ;;  %597 = vrot.lane.b32.xlu0 %v283_v25, %s2844_s20 }
  0x49   : > { %603 = vrot.lane.b32.xlu1 %v286_v26, %s2844_s20  ;;  %601 = vrot.lane.b32.xlu0 %v285_v27, %s2844_s20 }
  0x4d   : > { %607 = vrot.lane.b32.xlu1 %v288_v28, %s2844_s20  ;;  %605 = vrot.lane.b32.xlu0 %v287_v29, %s2844_s20 }
  0x51   : > { %611 = vrot.lane.b32.xlu1 %v290_v30, %s2844_s20  ;;  %609 = vrot.lane.b32.xlu0 %v289_v31, %s2844_s20  ;;  %v2614_v31 = vld [vmem:[%s2896_s19 + $0x62] sm:$0xff] }
  0x55   : > { %679 = vrot.lane.b32.xlu1 %v292_v32, %s2845_s21  ;;  %677 = vrot.lane.b32.xlu0 %v291_v33, %s2845_s21 }
  0x59   : > { %683 = vrot.lane.b32.xlu1 %v294_v34, %s2845_s21  ;;  %681 = vrot.lane.b32.xlu0 %v293_v35, %s2845_s21 }
  0x5d   : > { %687 = vrot.lane.b32.xlu1 %v296_v36, %s2845_s21  ;;  %685 = vrot.lane.b32.xlu0 %v295_v37, %s2845_s21 }
  0x61   : > { %805 = vrot.lane.b32.xlu1 %v3029_v38, %s2846_s22  ;;  %689 = vrot.lane.b32.xlu0 %v3032_v39, %s2845_s21 }
  0x65   : > { %933 = vrot.lane.b32.xlu1 %v2899_v0, %s2847_s23  ;;  %807 = vrot.lane.b32.xlu0 %v3039_v40, %s2846_s22  ;;  %v2613_v0 = vld [vmem:[%s2896_s19 + $0x52] sm:$0xff] }
  0x69   : > { %1061 = vrot.lane.b32.xlu1 %v293_v35, %s2848_s28  ;;  %935 = vrot.lane.b32.xlu0 %v2906_v2, %s2847_s23 }
  0x6d   : > { %1189 = vrot.lane.b32.xlu1 %v3055_v44, %s2849_s6  ;;  %1063 = vrot.lane.b32.xlu0 %v294_v34, %s2848_s28 }
  0x71   : > { %1191 = vrot.lane.b32.xlu1 %v3067_v48, %s2849_s6  ;;  %809 = vrot.lane.b32.xlu0 %v3055_v44, %s2846_s22 }
  0x75   : > { %811 = vrot.lane.b32.xlu1 %v3067_v48, %s2846_s22  ;;  %1317 = vrot.lane.b32.xlu0 %v2916_v5, %s2850_s9 }
  0x79   : > { %1319 = vrot.lane.b32.xlu1 %v2913_v4, %s2850_s9  ;;  %937 = vrot.lane.b32.xlu0 %v2916_v5, %s2847_s23  ;;  %v238_v5 = vld [vmem:[%s2896_s19 + $0x80] sm:$0xff] }
  0x7d   : > { %939 = vrot.lane.b32.xlu1 %v2913_v4, %s2847_s23  ;;  %1445 = vrot.lane.b32.xlu0 %v295_v37, %s2851_s10 }
  0x81   : > { %1447 = vrot.lane.b32.xlu1 %v296_v36, %s2851_s10  ;;  %1065 = vrot.lane.b32.xlu0 %v295_v37, %s2848_s28 }
  0x85   : > { %1193 = vrot.lane.b32.xlu1 %v2548_v50, %s2849_s6  ;;  %1067 = vrot.lane.b32.xlu0 %v296_v36, %s2848_s28 }
  0x87   : > { %v3093_v52 = vpop.permute.xlu1 %553  ;;  %v3095_v53 = vpop.permute.xlu0 %549 }
  0x89   : > { %1195 = vrot.lane.b32.xlu1 %v2549_v51, %s2849_s6  ;;  %813 = vrot.lane.b32.xlu0 %v2548_v50, %s2846_s22 }
  0x8b   : > { %v3099_v54 = vpop.permute.xlu1 %555  ;;  %v3101_v55 = vpop.permute.xlu0 %551 }
  0x8d   : > { %815 = vrot.lane.b32.xlu1 %v2549_v51, %s2846_s22  ;;  %1321 = vrot.lane.b32.xlu0 %v2926_v7, %s2850_s9 }
  0x8f   : > { %v3106_v56 = vpop.permute.xlu1 %559  ;;  %v3108_v57 = vpop.permute.xlu0 %557 }
  0x91   : > { %1323 = vrot.lane.b32.xlu1 %v2923_v6, %s2850_s9  ;;  %941 = vrot.lane.b32.xlu0 %v2926_v7, %s2847_s23 }
  0x93   : > { %v564_v58 = vpop.permute.xlu1 %563  ;;  %v562_v59 = vpop.permute.xlu0 %561 }
  0x94   : > { %v3115_v60 = vsel %vm1541_vm1, %v2549_v51, %v564_v58  ;;  %v3118_v61 = vsel %vm1541_vm1, %v2548_v50, %v562_v59 }
  0x95   : > { %943 = vrot.lane.b32.xlu1 %v2923_v6, %s2847_s23  ;;  %1449 = vrot.lane.b32.xlu0 %v3032_v39, %s2851_s10  ;;  %v237_v6 = vld [vmem:[%s2896_s19 + $0x78] sm:$0xff] }
  0x97   : > { %v568_v1 = vpop.permute.xlu1 %567  ;;  %v566_v2 = vpop.permute.xlu0 %565 }
  0x98   : > { %v3128_v3 = vsel %vm1541_vm1, %v236_v62, %v568_v1  ;;  %v3131_v4 = vsel %vm1541_vm1, %v235_v63, %v566_v2 }
  0x99   : > { %1451 = vrot.lane.b32.xlu1 %v2613_v0, %s2851_s10  ;;  %1069 = vrot.lane.b32.xlu0 %v3032_v39, %s2848_s28 }
  0x9b   : > { %v572_v7 = vpop.permute.xlu1 %571  ;;  %v570_v20 = vpop.permute.xlu0 %569 }
  0x9c   : > { %v3139_v21 = vsel %vm1541_vm1, %v238_v5, %v572_v7  ;;  %v3142_v22 = vsel %vm1541_vm1, %v237_v6, %v570_v20  ;;  %v3246_v7 = vld [vmem:[%s2896_s19 + $0x98] sm:$0xff] }
  0x9d   : > { %1197 = vrot.lane.b32.xlu1 %v235_v63, %s2849_s6  ;;  %1071 = vrot.lane.b32.xlu0 %v2613_v0, %s2848_s28 }
  0x9f   : > { %v3149_v24 = vpop.permute.xlu1 %575  ;;  %v574_v25 = vpop.permute.xlu0 %573 }
  0xa0   : > { %v3153_v26 = vsel %vm1541_vm1, %v3147_v23, %v574_v25 }
  0xa1   : > { %817 = vrot.lane.b32.xlu1 %v235_v63, %s2846_s22  ;;  %691 = vrot.lane.b32.xlu0 %v2613_v0, %s2845_s21 }
  0xa3   : > { %v3157_v27 = vpop.permute.xlu1 %579  ;;  %v3159_v28 = vpop.permute.xlu0 %577 }
  0xa5   : > { %1325 = vrot.lane.b32.xlu1 %v2936_v9, %s2850_s9  ;;  %1199 = vrot.lane.b32.xlu0 %v236_v62, %s2849_s6 }
  0xa7   : > { %v3164_v29 = vpop.permute.xlu1 %583  ;;  %v3166_v30 = vpop.permute.xlu0 %581 }
  0xa9   : > { %945 = vrot.lane.b32.xlu1 %v2936_v9, %s2847_s23  ;;  %819 = vrot.lane.b32.xlu0 %v236_v62, %s2846_s22  ;;  %v2615_v9 = vld [vmem:[%s2896_s19 + $0x6a] sm:$0xff] }
  0xab   : > { %v3172_v32 = vpop.permute.xlu1 %587  ;;  %v3174_v33 = vpop.permute.xlu0 %585 }
  0xad   : > { %1453 = vrot.lane.b32.xlu1 %v2614_v31, %s2851_s10  ;;  %1327 = vrot.lane.b32.xlu0 %v2933_v8, %s2850_s9 }
  0xaf   : > { %v3179_v34 = vpop.permute.xlu1 %591  ;;  %v3181_v35 = vpop.permute.xlu0 %589 }
  0xb1   : > { %1073 = vrot.lane.b32.xlu1 %v2614_v31, %s2848_s28  ;;  %947 = vrot.lane.b32.xlu0 %v2933_v8, %s2847_s23 }
  0xb3   : > { %v3187_v36 = vpop.permute.xlu1 %595  ;;  %v3189_v37 = vpop.permute.xlu0 %593 }
  0xb5   : > { %693 = vrot.lane.b32.xlu1 %v2614_v31, %s2845_s21  ;;  %1455 = vrot.lane.b32.xlu0 %v2615_v9, %s2851_s10 }
  0xb7   : > { %v3193_v39 = vpop.permute.xlu1 %599  ;;  %v3195_v41 = vpop.permute.xlu0 %597 }
  0xb8   : > { %4253 = vst [vmem:[#allocation2_spill] sm:$0xff] %v3193_v39  ;;  %4254 = vst [vmem:[#allocation3_spill] sm:$0xff] %v3195_v41 }
  0xb9   : > { %1201 = vrot.lane.b32.xlu1 %v237_v6, %s2849_s6  ;;  %1075 = vrot.lane.b32.xlu0 %v2615_v9, %s2848_s28 }
  0xbb   : > { %v3199_v42 = vpop.permute.xlu1 %603  ;;  %v3201_v8 = vpop.permute.xlu0 %601 }
  0xbc   : > { %4255 = vst [vmem:[#allocation4_spill] sm:$0xff] %v3199_v42  ;;  %4256 = vst [vmem:[#allocation5_spill] sm:$0xff] %v3201_v8 }
  0xbd   : > { %821 = vrot.lane.b32.xlu1 %v237_v6, %s2846_s22  ;;  %695 = vrot.lane.b32.xlu0 %v2615_v9, %s2845_s21 }
  0xbf   : > { %v3205_v43 = vpop.permute.xlu1 %607  ;;  %v3207_v45 = vpop.permute.xlu0 %605 }
  0xc0   : > { %4257 = vst [vmem:[#allocation6_spill] sm:$0xff] %v3205_v43  ;;  %4258 = vst [vmem:[#allocation7_spill] sm:$0xff] %v3207_v45  ;;  %v2619_v45 = vld [vmem:[%s2896_s19 + $0x9a] sm:$0xff] }
  0xc1   : > { %1329 = vrot.lane.b32.xlu1 %v2946_v11, %s2850_s9  ;;  %1203 = vrot.lane.b32.xlu0 %v238_v5, %s2849_s6 }
  0xc3   : > { %v3212_v46 = vpop.permute.xlu1 %611  ;;  %v3214_v47 = vpop.permute.xlu0 %609 }
  0xc4   : > { %4259 = vst [vmem:[#allocation8_spill] sm:$0xff] %v3212_v46  ;;  %4260 = vst [vmem:[#allocation9_spill] sm:$0xff] %v3214_v47  ;;  %v228_v46 = vld [vmem:[%s2896_s19 + $0x8] sm:$0xff] }
  0xc5   : > { %949 = vrot.lane.b32.xlu1 %v2946_v11, %s2847_s23  ;;  %823 = vrot.lane.b32.xlu0 %v238_v5, %s2846_s22  ;;  %v2617_v11 = vld [vmem:[%s2896_s19 + $0x82] sm:$0xff] }
  0xc7   : > { %v680_v50 = vpop.permute.xlu1 %679  ;;  %v678_v51 = vpop.permute.xlu0 %677 }
  0xc9   : > { %1457 = vrot.lane.b32.xlu1 %v2616_v49, %s2851_s10  ;;  %1331 = vrot.lane.b32.xlu0 %v2943_v10, %s2850_s9 }
  0xcb   : > { %v3223_v58 = vpop.permute.xlu1 %683  ;;  %v3225_v59 = vpop.permute.xlu0 %681 }
  0xcd   : > { %1077 = vrot.lane.b32.xlu1 %v2616_v49, %s2848_s28  ;;  %951 = vrot.lane.b32.xlu0 %v2943_v10, %s2847_s23 }
  0xcf   : > { %v3231_v62 = vpop.permute.xlu1 %687  ;;  %v3233_v63 = vpop.permute.xlu0 %685 }
  0xd1   : > { %697 = vrot.lane.b32.xlu1 %v2616_v49, %s2845_s21  ;;  %1459 = vrot.lane.b32.xlu0 %v2617_v11, %s2851_s10  ;;  %v227_v49 = vld [vmem:[%s2896_s19] sm:$0xff] }
  0xd3   : > { %v806_v0 = vpop.permute.xlu1 %805  ;;  %v3237_v1 = vpop.permute.xlu0 %689 }
  0xd5   : > { %1205 = vrot.lane.b32.xlu1 %v3147_v23, %s2849_s6  ;;  %1079 = vrot.lane.b32.xlu0 %v2617_v11, %s2848_s28 }
  0xd7   : > { %v934_v10 = vpop.permute.xlu1 %933  ;;  %v808_v2 = vpop.permute.xlu0 %807 }
  0xd9   : > { %825 = vrot.lane.b32.xlu1 %v3147_v23, %s2846_s22  ;;  %699 = vrot.lane.b32.xlu0 %v2617_v11, %s2845_s21  ;;  %v2618_v23 = vld [vmem:[%s2896_s19 + $0x92] sm:$0xff] }
  0xdb   : > { %v1062_v5 = vpop.permute.xlu1 %1061  ;;  %v936_v6 = vpop.permute.xlu0 %935 }
  0xdd   : > { %1333 = vrot.lane.b32.xlu1 %v2956_v13, %s2850_s9  ;;  %1207 = vrot.lane.b32.xlu0 %v3246_v7, %s2849_s6 }
  0xdf   : > { %v1190_v20 = vpop.permute.xlu1 %1189  ;;  %v1064_v25 = vpop.permute.xlu0 %1063 }
  0xe1   : > { %953 = vrot.lane.b32.xlu1 %v2956_v13, %s2847_s23  ;;  %827 = vrot.lane.b32.xlu0 %v3246_v7, %s2846_s22  ;;  %v1542_v13 = vsel %vm1541_vm1, %v227_v49, %v3095_v53  ;;  %v1543_v53 = vsel %vm1541_vm1, %v228_v46, %v3101_v55 }
  0xe2   : > { %v1575_v43 = vsel %vm1574_vm2, %v1542_v13, %v678_v51  ;;  %v3285_v13 = vld [vmem:[%s2896_s19 + $0xa8] sm:$0xff] }
  0xe3   : > { %v1192_v31 = vpop.permute.xlu1 %1191  ;;  %v3257_v9 = vpop.permute.xlu0 %809  ;;  %v1608_v42 = vsel %vm1607_vm3, %v1575_v43, %v806_v0 }
  0xe4   : > { %v1641_v41 = vsel %vm1640_vm4, %v1608_v42, %v934_v10 }
  0xe5   : > { %1461 = vrot.lane.b32.xlu1 %v2618_v23, %s2851_s10  ;;  %1335 = vrot.lane.b32.xlu0 %v2953_v12, %s2850_s9  ;;  %v1674_v49 = vsel %vm1673_vm5, %v1641_v41, %v1062_v5 }
  0xe6   : > { %v1707_v43 = vsel %vm1706_vm6, %v1674_v49, %v1190_v20 }
  0xe7   : > { %v3263_v11 = vpop.permute.xlu1 %811  ;;  %v1318_v47 = vpop.permute.xlu0 %1317 }
  0xe8   : > { %v1740_v0 = vsel %vm1739_vm7, %v1707_v43, %v1318_v47 }
  0xe9   : > { %1081 = vrot.lane.b32.xlu1 %v2618_v23, %s2848_s28  ;;  %955 = vrot.lane.b32.xlu0 %v2953_v12, %s2847_s23  ;;  %v1576_v12 = vsel %vm1574_vm2, %v1543_v53, %v680_v50 }
  0xea   : > { %v1609_v51 = vsel %vm1607_vm3, %v1576_v12, %v808_v2  ;;  %v1544_v12 = vsel %vm1541_vm1, %v3029_v38, %v3093_v52 }
  0xeb   : > { %v1320_v8 = vpop.permute.xlu1 %1319  ;;  %v938_v39 = vpop.permute.xlu0 %937  ;;  %v1642_v55 = vsel %vm1640_vm4, %v1609_v51, %v936_v6 }
  0xec   : > { %v1675_v46 = vsel %vm1673_vm5, %v1642_v55, %v1064_v25  ;;  %v1545_v55 = vsel %vm1541_vm1, %v3039_v40, %v3099_v54 }
  0xed   : > { %701 = vrot.lane.b32.xlu1 %v2618_v23, %s2845_s21  ;;  %1463 = vrot.lane.b32.xlu0 %v2619_v45, %s2851_s10  ;;  %v1708_v50 = vsel %vm1706_vm6, %v1675_v46, %v1192_v31  ;;  %v3302_v23 = vld [vmem:[%s2896_s19 + $0xb0] sm:$0xff]  ;;  %v1578_v52 = vsel %vm1574_vm2, %v1545_v55, %v3223_v58 }
  0xee   : > { %v1741_v47 = vsel %vm1739_vm7, %v1708_v50, %v1320_v8 }
  0xef   : > { %v940_v42 = vpop.permute.xlu1 %939  ;;  %v1446_v10 = vpop.permute.xlu0 %1445 }
  0xf0   : > { %v1773_v41 = vsel %vm1772_vm8, %v1740_v0, %v1446_v10 }
  0xf1   : > { %1209 = vrot.lane.b32.xlu1 %v3285_v13, %s2849_s6  ;;  %1083 = vrot.lane.b32.xlu0 %v2619_v45, %s2848_s28 }
  0xf2   : > { %2725 = vmatprep.mubr.msk.f32.mxu0 %vm1810_vm9, %v1773_v41 }
  0xf3   : > { %v1448_v2 = vpop.permute.xlu1 %1447  ;;  %v1066_v5 = vpop.permute.xlu0 %1065 }
  0xf4   : > { %v1774_v6 = vsel %vm1772_vm8, %v1741_v47, %v1448_v2 }
  0xf5   : > { %829 = vrot.lane.b32.xlu1 %v3285_v13, %s2846_s22  ;;  %703 = vrot.lane.b32.xlu0 %v2619_v45, %s2845_s21  ;;  %v2620_v45 = vld [vmem:[%s2896_s19 + $0xaa] sm:$0xff] }
  0xf6   : > { %2726 = vmatmul.mubr.msk.f32.vlgmr.msra.gmra.mrb[0].mxu0 %vm1810_vm9, %v1774_v6 }
  0xf7   : > { %v1194_v20 = vpop.permute.xlu1 %1193  ;;  %v1068_v25 = vpop.permute.xlu0 %1067 }
  0xf9   : > { %1337 = vrot.lane.b32.xlu1 %v2966_v15, %s2850_s9  ;;  %1211 = vrot.lane.b32.xlu0 %v3302_v23, %s2849_s6 }
  0xfb   : > { %v1196_v8 = vpop.permute.xlu1 %1195  ;;  %v814_v31 = vpop.permute.xlu0 %813 }
  0xfd   : > { %957 = vrot.lane.b32.xlu1 %v2966_v15, %s2847_s23  ;;  %831 = vrot.lane.b32.xlu0 %v3302_v23, %s2846_s22  ;;  %v1577_v15 = vsel %vm1574_vm2, %v1544_v12, %v3225_v59 }
  0xfe   : > { %v1610_v43 = vsel %vm1607_vm3, %v1577_v15, %v3257_v9  ;;  %v2621_v9 = vld [vmem:[%s2896_s19 + $0xb2] sm:$0xff]  ;;  %v1546_v15 = vsel %vm1541_vm1, %v3055_v44, %v3108_v57 }
  0xff   : > { %v3313_v53 = vpop.permute.xlu1 %815  ;;  %v1322_v49 = vpop.permute.xlu0 %1321  ;;  %v1643_v10 = vsel %vm1640_vm4, %v1610_v43, %v938_v39  ;;  %v1611_v39 = vsel %vm1607_vm3, %v1578_v52, %v3263_v11  ;;  %v1579_v43 = vsel %vm1574_vm2, %v1546_v15, %v3233_v63 }
 0x100   : > { %v1676_v38 = vsel %vm1673_vm5, %v1643_v10, %v1066_v5  ;;  %v1644_v46 = vsel %vm1640_vm4, %v1611_v39, %v940_v42  ;;  %v3349_v5 = vld [vmem:[%s2896_s19 + $0xc0] sm:$0xff]  ;;  %v1612_v10 = vsel %vm1607_vm3, %v1579_v43, %v814_v31  ;;  %v2623_v39 = vld [vmem:[%s2896_s19 + $0xca] sm:$0xff] }
 0x101   : > { %1465 = vrot.lane.b32.xlu1 %v2620_v45, %s2851_s10  ;;  %1339 = vrot.lane.b32.xlu0 %v2963_v14, %s2850_s9  ;;  %v1709_v59 = vsel %vm1706_vm6, %v1676_v38, %v1194_v20 }
 0x102   : > { %v1742_v41 = vsel %vm1739_vm7, %v1709_v59, %v1322_v49 }
 0x103   : > { %v1324_v51 = vpop.permute.xlu1 %1323  ;;  %v942_v0 = vpop.permute.xlu0 %941 }
 0x104   : > { %v1645_v52 = vsel %vm1640_vm4, %v1612_v10, %v942_v0 }
 0x105   : > { %1085 = vrot.lane.b32.xlu1 %v2620_v45, %s2848_s28  ;;  %959 = vrot.lane.b32.xlu0 %v2963_v14, %s2847_s23  ;;  %v1677_v14 = vsel %vm1673_vm5, %v1644_v46, %v1068_v25 }
 0x106   : > { %v1710_v58 = vsel %vm1706_vm6, %v1677_v14, %v1196_v8 }
 0x107   : > { %v944_v40 = vpop.permute.xlu1 %943  ;;  %v1450_v54 = vpop.permute.xlu0 %1449  ;;  %v1743_v11 = vsel %vm1739_vm7, %v1710_v58, %v1324_v51  ;;  %v2622_v51 = vld [vmem:[%s2896_s19 + $0xc2] sm:$0xff]  ;;  %v3410_v58 = vld [vmem:[%s2896_s19 + $0xd8] sm:$0xff] }
 0x108   : > { %v1775_v50 = vsel %vm1772_vm8, %v1742_v41, %v1450_v54 }
 0x109   : > { %705 = vrot.lane.b32.xlu1 %v2620_v45, %s2845_s21  ;;  %1467 = vrot.lane.b32.xlu0 %v2621_v9, %s2851_s10  ;;  %v3362_v45 = vld [vmem:[%s2896_s19 + $0xc8] sm:$0xff] }
 0x10a   : > { %2728 = vmatprep.mubr.msk.f32.mxu0 %vm1810_vm9, %v1775_v50 }
 0x10b   : > { %v1452_v47 = vpop.permute.xlu1 %1451  ;;  %v1070_v2 = vpop.permute.xlu0 %1069 }
 0x10c   : > { %v1776_v42 = vsel %vm1772_vm8, %v1743_v11, %v1452_v47  ;;  %v1678_v44 = vsel %vm1673_vm5, %v1645_v52, %v1070_v2 }
 0x10d   : > { %1213 = vrot.lane.b32.xlu1 %v3349_v5, %s2849_s6  ;;  %1087 = vrot.lane.b32.xlu0 %v2621_v9, %s2848_s28 }
 0x10e   : > { %2729 = vmatmul.mubr.msk.f32.gmra.mrb[2].mxu0 %vm1810_vm9, %v1776_v42  ;;  %v3425_v42 = vld [vmem:[%s2896_s19 + $0xe0] sm:$0xff] }
 0x10f   : > { %v1198_v6 = vpop.permute.xlu1 %1197  ;;  %v1072_v20 = vpop.permute.xlu0 %1071 }
 0x111   : > { %833 = vrot.lane.b32.xlu1 %v3349_v5, %s2846_s22  ;;  %707 = vrot.lane.b32.xlu0 %v2621_v9, %s2845_s21  ;;  %v1547_v9 = vsel %vm1541_vm1, %v3067_v48, %v3106_v56 }
 0x112   : > { %v1580_v0 = vsel %vm1574_vm2, %v1547_v9, %v3231_v62 }
 0x113   : > { %v818_v25 = vpop.permute.xlu1 %817  ;;  %v3359_v8 = vpop.permute.xlu0 %691  ;;  %v1613_v41 = vsel %vm1607_vm3, %v1580_v0, %v3313_v53 }
 0x114   : > { %v1646_v50 = vsel %vm1640_vm4, %v1613_v41, %v944_v40 }
 0x115   : > { %1341 = vrot.lane.b32.xlu1 %v2976_v17, %s2850_s9  ;;  %1215 = vrot.lane.b32.xlu0 %v3362_v45, %s2849_s6  ;;  %v1679_v48 = vsel %vm1673_vm5, %v1646_v50, %v1072_v20  ;;  %v2594_v50 = vld [vmem:[%s2896_s19 + $0xf1] sm:$0xff] }
 0x117   : > { %v1326_v49 = vpop.permute.xlu1 %1325  ;;  %v1200_v12 = vpop.permute.xlu0 %1199 }
 0x119   : > { %961 = vrot.lane.b32.xlu1 %v2976_v17, %s2847_s23  ;;  %835 = vrot.lane.b32.xlu0 %v3362_v45, %s2846_s22  ;;  %v1711_v17 = vsel %vm1706_vm6, %v1678_v44, %v1198_v6  ;;  %v2499_v44 = vld [vmem:[%s2896_s19 + $0xe1] sm:$0xff] }
 0x11a   : > { %v1744_v57 = vsel %vm1739_vm7, %v1711_v17, %v1326_v49  ;;  %v1581_v49 = vsel %vm1574_vm2, %v3118_v61, %v3237_v1 }
 0x11b   : > { %v946_v55 = vpop.permute.xlu1 %945  ;;  %v3379_v38 = vpop.permute.xlu0 %819  ;;  %v1614_v15 = vsel %vm1607_vm3, %v1581_v49, %v818_v25 }
 0x11c   : > { %v1647_v10 = vsel %vm1640_vm4, %v1614_v15, %v946_v55  ;;  %v1582_v55 = vsel %vm1574_vm2, %v3115_v60, %v3359_v8 }
 0x11d   : > { %1469 = vrot.lane.b32.xlu1 %v2622_v51, %s2851_s10  ;;  %1343 = vrot.lane.b32.xlu0 %v2973_v16, %s2850_s9 }
 0x11f   : > { %v1454_v63 = vpop.permute.xlu1 %1453  ;;  %v1328_v59 = vpop.permute.xlu0 %1327 }
 0x120   : > { %v1777_v31 = vsel %vm1772_vm8, %v1744_v57, %v1454_v63  ;;  %v1615_v57 = vsel %vm1607_vm3, %v1582_v55, %v3379_v38  ;;  %v3469_v38 = vld [vmem:[%s2896_s19 + $0xf0] sm:$0xff] }
 0x121   : > { %1089 = vrot.lane.b32.xlu1 %v2622_v51, %s2848_s28  ;;  %963 = vrot.lane.b32.xlu0 %v2973_v16, %s2847_s23  ;;  %v1712_v16 = vsel %vm1706_vm6, %v1679_v48, %v1200_v12  ;;  %v2624_v12 = vld [vmem:[%s2896_s19 + $0xda] sm:$0xff] }
 0x122   : > { %2731 = vmatprep.mubr.msk.f32.mxu0 %vm1810_vm9, %v1777_v31  ;;  %v1745_v56 = vsel %vm1739_vm7, %v1712_v16, %v1328_v59 }
 0x123   : > { %v1074_v54 = vpop.permute.xlu1 %1073  ;;  %v948_v46 = vpop.permute.xlu0 %947 }
 0x124   : > { %v1680_v52 = vsel %vm1673_vm5, %v1647_v10, %v1074_v54  ;;  %v1648_v31 = vsel %vm1640_vm4, %v1615_v57, %v948_v46 }
 0x125   : > { %709 = vrot.lane.b32.xlu1 %v2622_v51, %s2845_s21  ;;  %1471 = vrot.lane.b32.xlu0 %v2623_v39, %s2851_s10 }
 0x127   : > { %v3407_v62 = vpop.permute.xlu1 %693  ;;  %v1456_v14 = vpop.permute.xlu0 %1455 }
 0x128   : > { %v1778_v53 = vsel %vm1772_vm8, %v1745_v56, %v1456_v14  ;;  %v3485_v56 = vld [vmem:[%s2896_s19 + $0xf8] sm:$0xff] }
 0x129   : > { %1217 = vrot.lane.b32.xlu1 %v3410_v58, %s2849_s6  ;;  %1091 = vrot.lane.b32.xlu0 %v2623_v39, %s2848_s28 }
 0x12a   : > { %2732 = vmatmul.mubr.msk.f32.gmra.mrb[4].mxu0 %vm1810_vm9, %v1778_v53 }
 0x12b   : > { %v1202_v40 = vpop.permute.xlu1 %1201  ;;  %v1076_v11 = vpop.permute.xlu0 %1075 }
 0x12c   : > { %v1681_v9 = vsel %vm1673_vm5, %v1648_v31, %v1076_v11  ;;  %v2626_v11 = vld [vmem:[%s2896_s19 + $0xf2] sm:$0xff] }
 0x12d   : > { %837 = vrot.lane.b32.xlu1 %v3410_v58, %s2846_s22  ;;  %711 = vrot.lane.b32.xlu0 %v2623_v39, %s2845_s21 }
 0x12f   : > { %v3420_v47 = vpop.permute.xlu1 %821  ;;  %v3422_v2 = vpop.permute.xlu0 %695 }
 0x131   : > { %1345 = vrot.lane.b32.xlu1 %v2986_v19, %s2850_s9  ;;  %1219 = vrot.lane.b32.xlu0 %v3425_v42, %s2849_s6 }
 0x133   : > { %v1330_v6 = vpop.permute.xlu1 %1329  ;;  %v1204_v20 = vpop.permute.xlu0 %1203 }
 0x134   : > { %v1714_v0 = vsel %vm1706_vm6, %v1681_v9, %v1204_v20  ;;  %v2596_v9 = vld [vmem:[%s2896_s19 + $0x109] sm:$0xff] }
 0x135   : > { %965 = vrot.lane.b32.xlu1 %v2986_v19, %s2847_s23  ;;  %839 = vrot.lane.b32.xlu0 %v3425_v42, %s2846_s22  ;;  %v1713_v19 = vsel %vm1706_vm6, %v1680_v52, %v1202_v40  ;;  %v1583_v40 = vsel %vm1574_vm2, %v3131_v4, %v3407_v62 }
 0x136   : > { %v1746_v61 = vsel %vm1739_vm7, %v1713_v19, %v1330_v6  ;;  %v2595_v6 = vld [vmem:[%s2896_s19 + $0xf9] sm:$0xff]  ;;  %v1616_v20 = vsel %vm1607_vm3, %v1583_v40, %v3420_v47 }
 0x137   : > { %v950_v43 = vpop.permute.xlu1 %949  ;;  %v3440_v51 = vpop.permute.xlu0 %823 }
 0x138   : > { %v1649_v15 = vsel %vm1640_vm4, %v1616_v20, %v950_v43  ;;  %v1584_v43 = vsel %vm1574_vm2, %v3128_v3, %v3422_v2 }
 0x139   : > { %1473 = vrot.lane.b32.xlu1 %v2624_v12, %s2851_s10  ;;  %1347 = vrot.lane.b32.xlu0 %v2983_v18, %s2850_s9  ;;  %v2625_v18 = vld [vmem:[%s2896_s19 + $0xe2] sm:$0xff] }
 0x13b   : > { %v1458_v1 = vpop.permute.xlu1 %1457  ;;  %v1332_v25 = vpop.permute.xlu0 %1331 }
 0x13c   : > { %v1779_v17 = vsel %vm1772_vm8, %v1746_v61, %v1458_v1  ;;  %v1747_v60 = vsel %vm1739_vm7, %v1714_v0, %v1332_v25  ;;  %v1617_v61 = vsel %vm1607_vm3, %v1584_v43, %v3440_v51  ;;  %v3527_v51 = vld [vmem:[%s2896_s19 + $0x108] sm:$0xff] }
 0x13d   : > { %1093 = vrot.lane.b32.xlu1 %v2624_v12, %s2848_s28  ;;  %967 = vrot.lane.b32.xlu0 %v2499_v44, %s2847_s23  ;;  %v2627_v44 = vld [vmem:[%s2896_s19 + $0xfa] sm:$0xff] }
 0x13e   : > { %2734 = vmatprep.mubr.msk.f32.mxu0 %vm1810_vm9, %v1779_v17 }
 0x13f   : > { %v1078_v63 = vpop.permute.xlu1 %1077  ;;  %v952_v59 = vpop.permute.xlu0 %951 }
 0x140   : > { %v1682_v10 = vsel %vm1673_vm5, %v1649_v15, %v1078_v63  ;;  %v1650_v17 = vsel %vm1640_vm4, %v1617_v61, %v952_v59 }
 0x141   : > { %713 = vrot.lane.b32.xlu1 %v2624_v12, %s2845_s21  ;;  %1475 = vrot.lane.b32.xlu0 %v2625_v18, %s2851_s10 }
 0x143   : > { %v3466_v8 = vpop.permute.xlu1 %697  ;;  %v1460_v39 = vpop.permute.xlu0 %1459 }
 0x144   : > { %v1780_v41 = vsel %vm1772_vm8, %v1747_v60, %v1460_v39  ;;  %v3543_v39 = vld [vmem:[%s2896_s19 + $0x110] sm:$0xff] }
 0x145   : > { %1221 = vrot.lane.b32.xlu1 %v3469_v38, %s2849_s6  ;;  %1095 = vrot.lane.b32.xlu0 %v2625_v18, %s2848_s28 }
 0x146   : > { %2735 = vmatmul.mubr.msk.f32.gmra.mrb[6].mxu0 %vm1810_vm9, %v1780_v41 }
 0x147   : > { %v1206_v54 = vpop.permute.xlu1 %1205  ;;  %v1080_v46 = vpop.permute.xlu0 %1079 }
 0x148   : > { %v1715_v52 = vsel %vm1706_vm6, %v1682_v10, %v1206_v54  ;;  %v1683_v55 = vsel %vm1673_vm5, %v1650_v17, %v1080_v46  ;;  %v1585_v46 = vsel %vm1574_vm2, %v3142_v22, %v3466_v8 }
 0x149   : > { %841 = vrot.lane.b32.xlu1 %v3469_v38, %s2846_s22  ;;  %715 = vrot.lane.b32.xlu0 %v2625_v18, %s2845_s21 }
 0x14b   : > { %v3480_v48 = vpop.permute.xlu1 %825  ;;  %v3482_v16 = vpop.permute.xlu0 %699 }
 0x14d   : > { %1349 = vrot.lane.b32.xlu1 %v2594_v50, %s2850_s9  ;;  %1223 = vrot.lane.b32.xlu0 %v3485_v56, %s2849_s6 }
 0x14f   : > { %v1334_v14 = vpop.permute.xlu1 %1333  ;;  %v1208_v53 = vpop.permute.xlu0 %1207 }
 0x150   : > { %v1748_v4 = vsel %vm1739_vm7, %v1715_v52, %v1334_v14  ;;  %v1716_v18 = vsel %vm1706_vm6, %v1683_v55, %v1208_v53  ;;  %v2597_v14 = vld [vmem:[%s2896_s19 + $0x111] sm:$0xff]  ;;  %v1618_v53 = vsel %vm1607_vm3, %v1585_v46, %v3480_v48  ;;  %v2598_v55 = vld [vmem:[%s2896_s19 + $0x121] sm:$0xff] }
 0x151   : > { %969 = vrot.lane.b32.xlu1 %v2594_v50, %s2847_s23  ;;  %843 = vrot.lane.b32.xlu0 %v3485_v56, %s2846_s22  ;;  %v2628_v50 = vld [vmem:[%s2896_s19 + $0x10a] sm:$0xff]  ;;  %v2629_v52 = vld [vmem:[%s2896_s19 + $0x112] sm:$0xff] }
 0x153   : > { %v954_v49 = vpop.permute.xlu1 %953  ;;  %v3500_v12 = vpop.permute.xlu0 %827 }
 0x155   : > { %1477 = vrot.lane.b32.xlu1 %v2626_v11, %s2851_s10  ;;  %1351 = vrot.lane.b32.xlu0 %v2595_v6, %s2850_s9 }
 0x157   : > { %v1462_v62 = vpop.permute.xlu1 %1461  ;;  %v1336_v19 = vpop.permute.xlu0 %1335 }
 0x158   : > { %v1781_v47 = vsel %vm1772_vm8, %v1748_v4, %v1462_v62  ;;  %v1749_v3 = vsel %vm1739_vm7, %v1716_v18, %v1336_v19 }
 0x159   : > { %1097 = vrot.lane.b32.xlu1 %v2626_v11, %s2848_s28  ;;  %971 = vrot.lane.b32.xlu0 %v2595_v6, %s2847_s23  ;;  %v1651_v6 = vsel %vm1640_vm4, %v1618_v53, %v954_v49  ;;  %v1586_v49 = vsel %vm1574_vm2, %v3139_v21, %v3482_v16 }
 0x15a   : > { %2737 = vmatprep.mubr.msk.f32.mxu0 %vm1810_vm9, %v1781_v47  ;;  %v1619_v4 = vsel %vm1607_vm3, %v1586_v49, %v3500_v12  ;;  %v3585_v12 = vld [vmem:[%s2896_s19 + $0x120] sm:$0xff] }
 0x15b   : > { %v1082_v1 = vpop.permute.xlu1 %1081  ;;  %v956_v25 = vpop.permute.xlu0 %955 }
 0x15c   : > { %v1684_v20 = vsel %vm1673_vm5, %v1651_v6, %v1082_v1  ;;  %v1652_v47 = vsel %vm1640_vm4, %v1619_v4, %v956_v25 }
 0x15d   : > { %717 = vrot.lane.b32.xlu1 %v2626_v11, %s2845_s21  ;;  %1479 = vrot.lane.b32.xlu0 %v2627_v44, %s2851_s10 }
 0x15f   : > { %v3524_v2 = vpop.permute.xlu1 %701  ;;  %v1464_v57 = vpop.permute.xlu0 %1463 }
 0x160   : > { %v1782_v63 = vsel %vm1772_vm8, %v1749_v3, %v1464_v57  ;;  %v3601_v57 = vld [vmem:[%s2896_s19 + $0x128] sm:$0xff] }
 0x161   : > { %1225 = vrot.lane.b32.xlu1 %v3527_v51, %s2849_s6  ;;  %1099 = vrot.lane.b32.xlu0 %v2627_v44, %s2848_s28 }
 0x162   : > { %2738 = vmatmul.mubr.msk.f32.gmra.mrb[8].mxu0 %vm1810_vm9, %v1782_v63 }
 0x163   : > { %v1210_v59 = vpop.permute.xlu1 %1209  ;;  %v1084_v31 = vpop.permute.xlu0 %1083 }
 0x164   : > { %v1717_v15 = vsel %vm1706_vm6, %v1684_v20, %v1210_v59  ;;  %v1685_v43 = vsel %vm1673_vm5, %v1652_v47, %v1084_v31  ;;  %v1587_v31 = vsel %vm1574_vm2, %v3153_v26, %v3524_v2 }
 0x165   : > { %845 = vrot.lane.b32.xlu1 %v3527_v51, %s2846_s22  ;;  %719 = vrot.lane.b32.xlu0 %v2627_v44, %s2845_s21 }
 0x167   : > { %v3538_v0 = vpop.permute.xlu1 %829  ;;  %v3540_v60 = vpop.permute.xlu0 %703 }
 0x169   : > { %1353 = vrot.lane.b32.xlu1 %v2596_v9, %s2850_s9  ;;  %1227 = vrot.lane.b32.xlu0 %v3543_v39, %s2849_s6 }
 0x16b   : > { %v1338_v41 = vpop.permute.xlu1 %1337  ;;  %v1212_v54 = vpop.permute.xlu0 %1211 }
 0x16c   : > { %v1750_v22 = vsel %vm1739_vm7, %v1717_v15, %v1338_v41  ;;  %v1718_v44 = vsel %vm1706_vm6, %v1685_v43, %v1212_v54  ;;  %v2599_v41 = vld [vmem:[%s2896_s19 + $0x129] sm:$0xff]  ;;  %v1620_v54 = vsel %vm1607_vm3, %v1587_v31, %v3538_v0  ;;  %v1555_v15 = vsel %vm1541_vm1, %v3246_v7, %v3149_v24  ;;  %v2600_v43 = vld [vmem:[%s2896_s19 + $0x139] sm:$0xff] }
 0x16d   : > { %973 = vrot.lane.b32.xlu1 %v2596_v9, %s2847_s23  ;;  %847 = vrot.lane.b32.xlu0 %v3543_v39, %s2846_s22  ;;  %v2630_v9 = vld [vmem:[%s2896_s19 + $0x122] sm:$0xff] }
 0x16f   : > { %v958_v40 = vpop.permute.xlu1 %957  ;;  %v3558_v11 = vpop.permute.xlu0 %831 }
 0x171   : > { %1481 = vrot.lane.b32.xlu1 %v2628_v50, %s2851_s10  ;;  %1355 = vrot.lane.b32.xlu0 %v2597_v14, %s2850_s9 }
 0x173   : > { %v1466_v8 = vpop.permute.xlu1 %1465  ;;  %v1340_v10 = vpop.permute.xlu0 %1339 }
 0x174   : > { %v1783_v48 = vsel %vm1772_vm8, %v1750_v22, %v1466_v8  ;;  %v1751_v21 = vsel %vm1739_vm7, %v1718_v44, %v1340_v10  ;;  %v2631_v22 = vld [vmem:[%s2896_s19 + $0x12a] sm:$0xff] }
 0x175   : > { %1101 = vrot.lane.b32.xlu1 %v2628_v50, %s2848_s28  ;;  %975 = vrot.lane.b32.xlu0 %v2597_v14, %s2847_s23  ;;  %v1653_v14 = vsel %vm1640_vm4, %v1620_v54, %v958_v40  ;;  %v1588_v40 = vsel %vm1574_vm2, %v1555_v15, %v3540_v60 }
 0x176   : > { %2740 = vmatprep.mubr.msk.f32.mxu0 %vm1810_vm9, %v1783_v48  ;;  %v1621_v8 = vsel %vm1607_vm3, %v1588_v40, %v3558_v11  ;;  %v3645_v11 = vld [vmem:[%s2896_s19 + $0x138] sm:$0xff] }
 0x177   : > { %v1086_v62 = vpop.permute.xlu1 %1085  ;;  %v960_v19 = vpop.permute.xlu0 %959 }
 0x178   : > { %v1686_v53 = vsel %vm1673_vm5, %v1653_v14, %v1086_v62  ;;  %v1654_v49 = vsel %vm1640_vm4, %v1621_v8, %v960_v19 }
 0x179   : > { %721 = vrot.lane.b32.xlu1 %v2628_v50, %s2845_s21  ;;  %1483 = vrot.lane.b32.xlu0 %v2629_v52, %s2851_s10 }
 0x17b   : > { %v3582_v16 = vpop.permute.xlu1 %705  ;;  %v1468_v61 = vpop.permute.xlu0 %1467 }
 0x17c   : > { %v1784_v1 = vsel %vm1772_vm8, %v1751_v21, %v1468_v61  ;;  %v3661_v61 = vld [vmem:[%s2896_s19 + $0x140] sm:$0xff] }
 0x17d   : > { %1229 = vrot.lane.b32.xlu1 %v3585_v12, %s2849_s6  ;;  %1103 = vrot.lane.b32.xlu0 %v2629_v52, %s2848_s28 }
 0x17e   : > { %2741 = vmatmul.mubr.msk.f32.gmra.mrb[10].mxu0 %vm1810_vm9, %v1784_v1 }
 0x17f   : > { %v1214_v25 = vpop.permute.xlu1 %1213  ;;  %v1088_v17 = vpop.permute.xlu0 %1087 }
 0x180   : > { %v1719_v6 = vsel %vm1706_vm6, %v1686_v53, %v1214_v25  ;;  %v1687_v24 = vsel %vm1673_vm5, %v1654_v49, %v1088_v17  ;;  %v1556_v17 = vsel %vm1541_vm1, %v3285_v13, %v3159_v28  ;;  %v2602_v49 = vld [vmem:[%s2896_s19 + $0x151] sm:$0xff] }
 0x181   : > { %849 = vrot.lane.b32.xlu1 %v3585_v12, %s2846_s22  ;;  %723 = vrot.lane.b32.xlu0 %v2629_v52, %s2845_s21 }
 0x183   : > { %v3596_v18 = vpop.permute.xlu1 %833  ;;  %v3598_v3 = vpop.permute.xlu0 %707 }
 0x185   : > { %1357 = vrot.lane.b32.xlu1 %v2598_v55, %s2850_s9  ;;  %1231 = vrot.lane.b32.xlu0 %v3601_v57, %s2849_s6 }
 0x187   : > { %v1342_v63 = vpop.permute.xlu1 %1341  ;;  %v1216_v59 = vpop.permute.xlu0 %1215 }
 0x188   : > { %v1752_v26 = vsel %vm1739_vm7, %v1719_v6, %v1342_v63  ;;  %v1720_v7 = vsel %vm1706_vm6, %v1687_v24, %v1216_v59  ;;  %v2632_v63 = vld [vmem:[%s2896_s19 + $0x13a] sm:$0xff]  ;;  %v1557_v6 = vsel %vm1541_vm1, %v3302_v23, %v3157_v27  ;;  %v2570_v23 = vld [vmem:[%s2896_s19 + $0x150] sm:$0xff] }
 0x189   : > { %977 = vrot.lane.b32.xlu1 %v2598_v55, %s2847_s23  ;;  %851 = vrot.lane.b32.xlu0 %v3601_v57, %s2846_s22  ;;  %v1589_v55 = vsel %vm1574_vm2, %v1556_v17, %v3582_v16  ;;  %v2601_v59 = vld [vmem:[%s2896_s19 + $0x141] sm:$0xff]  ;;  %v2571_v24 = vld [vmem:[%s2896_s19 + $0x158] sm:$0xff] }
 0x18a   : > { %v1622_v31 = vsel %vm1607_vm3, %v1589_v55, %v3596_v18 }
 0x18b   : > { %v962_v46 = vpop.permute.xlu1 %961  ;;  %v3616_v50 = vpop.permute.xlu0 %835 }
 0x18c   : > { %v1655_v54 = vsel %vm1640_vm4, %v1622_v31, %v962_v46  ;;  %v1590_v46 = vsel %vm1574_vm2, %v1557_v6, %v3598_v3 }
 0x18d   : > { %1485 = vrot.lane.b32.xlu1 %v2630_v9, %s2851_s10  ;;  %1359 = vrot.lane.b32.xlu0 %v2599_v41, %s2850_s9 }
 0x18f   : > { %v1470_v2 = vpop.permute.xlu1 %1469  ;;  %v1344_v20 = vpop.permute.xlu0 %1343 }
 0x190   : > { %v1785_v0 = vsel %vm1772_vm8, %v1752_v26, %v1470_v2  ;;  %v1753_v60 = vsel %vm1739_vm7, %v1720_v7, %v1344_v20  ;;  %v2633_v26 = vld [vmem:[%s2896_s19 + $0x142] sm:$0xff]  ;;  %v1623_v2 = vsel %vm1607_vm3, %v1590_v46, %v3616_v50 }
 0x191   : > { %1105 = vrot.lane.b32.xlu1 %v2630_v9, %s2848_s28  ;;  %979 = vrot.lane.b32.xlu0 %v2599_v41, %s2847_s23 }
 0x192   : > { %2743 = vmatprep.mubr.msk.f32.mxu0 %vm1810_vm9, %v1785_v0 }
 0x193   : > { %v1090_v10 = vpop.permute.xlu1 %1089  ;;  %v964_v48 = vpop.permute.xlu0 %963 }
 0x194   : > { %v1688_v28 = vsel %vm1673_vm5, %v1655_v54, %v1090_v10  ;;  %v1656_v15 = vsel %vm1640_vm4, %v1623_v2, %v964_v48 }
 0x195   : > { %725 = vrot.lane.b32.xlu1 %v2630_v9, %s2845_s21  ;;  %1487 = vrot.lane.b32.xlu0 %v2631_v22, %s2851_s10 }
 0x197   : > { %v3642_v52 = vpop.permute.xlu1 %709  ;;  %v1472_v4 = vpop.permute.xlu0 %1471 }
 0x198   : > { %v1786_v62 = vsel %vm1772_vm8, %v1753_v60, %v1472_v4 }
 0x199   : > { %1233 = vrot.lane.b32.xlu1 %v3645_v11, %s2849_s6  ;;  %1107 = vrot.lane.b32.xlu0 %v2631_v22, %s2848_s28 }
 0x19a   : > { %2744 = vmatmul.mubr.msk.f32.gmra.mrb[12].mxu0 %vm1810_vm9, %v1786_v62 }
 0x19b   : > { %v1218_v19 = vpop.permute.xlu1 %1217  ;;  %v1092_v47 = vpop.permute.xlu0 %1091 }
 0x19c   : > { %v1721_v13 = vsel %vm1706_vm6, %v1688_v28, %v1218_v19  ;;  %v1689_v40 = vsel %vm1673_vm5, %v1656_v15, %v1092_v47  ;;  %v1558_v19 = vsel %vm1541_vm1, %v3349_v5, %v3166_v30 }
 0x19d   : > { %853 = vrot.lane.b32.xlu1 %v3645_v11, %s2846_s22  ;;  %727 = vrot.lane.b32.xlu0 %v2631_v22, %s2845_s21  ;;  %v1591_v47 = vsel %vm1574_vm2, %v1558_v19, %v3642_v52 }
 0x19f   : > { %v3656_v44 = vpop.permute.xlu1 %837  ;;  %v3658_v21 = vpop.permute.xlu0 %711 }
 0x1a1   : > { %1361 = vrot.lane.b32.xlu1 %v2600_v43, %s2850_s9  ;;  %1235 = vrot.lane.b32.xlu0 %v3661_v61, %s2849_s6 }
 0x1a3   : > { %v1346_v1 = vpop.permute.xlu1 %1345  ;;  %v1220_v25 = vpop.permute.xlu0 %1219 }
 0x1a4   : > { %v1754_v16 = vsel %vm1739_vm7, %v1721_v13, %v1346_v1  ;;  %v1722_v27 = vsel %vm1706_vm6, %v1689_v40, %v1220_v25  ;;  %v2603_v1 = vld [vmem:[%s2896_s19 + $0x159] sm:$0xff]  ;;  %v1624_v25 = vsel %vm1607_vm3, %v1591_v47, %v3656_v44  ;;  %v2604_v40 = vld [vmem:[%s2896_s19 + $0x169] sm:$0xff] }
 0x1a5   : > { %981 = vrot.lane.b32.xlu1 %v2600_v43, %s2847_s23  ;;  %855 = vrot.lane.b32.xlu0 %v3661_v61, %s2846_s22  ;;  %v2634_v43 = vld [vmem:[%s2896_s19 + $0x152] sm:$0xff] }
 0x1a7   : > { %v966_v9 = vpop.permute.xlu1 %965  ;;  %v3678_v41 = vpop.permute.xlu0 %839 }
 0x1a9   : > { %1489 = vrot.lane.b32.xlu1 %v2632_v63, %s2851_s10  ;;  %1363 = vrot.lane.b32.xlu0 %v2601_v59, %s2850_s9 }
 0x1ab   : > { %v1474_v14 = vpop.permute.xlu1 %1473  ;;  %v1348_v53 = vpop.permute.xlu0 %1347 }
 0x1ac   : > { %v1787_v18 = vsel %vm1772_vm8, %v1754_v16, %v1474_v14  ;;  %v1755_v3 = vsel %vm1739_vm7, %v1722_v27, %v1348_v53  ;;  %v2635_v16 = vld [vmem:[%s2896_s19 + $0x15a] sm:$0xff]  ;;  %v2573_v27 = vld [vmem:[%s2896_s19 + $0x170] sm:$0xff] }
 0x1ad   : > { %1109 = vrot.lane.b32.xlu1 %v2632_v63, %s2848_s28  ;;  %983 = vrot.lane.b32.xlu0 %v2601_v59, %s2847_s23 }
 0x1ae   : > { %2746 = vmatprep.mubr.msk.f32.mxu0 %vm1810_vm9, %v1787_v18 }
 0x1af   : > { %v1094_v20 = vpop.permute.xlu1 %1093  ;;  %v968_v0 = vpop.permute.xlu0 %967 }
 0x1b1   : > { %729 = vrot.lane.b32.xlu1 %v2632_v63, %s2845_s21  ;;  %1491 = vrot.lane.b32.xlu0 %v2633_v26, %s2851_s10  ;;  %v1657_v63 = vsel %vm1640_vm4, %v1624_v25, %v966_v9  ;;  %v1559_v9 = vsel %vm1541_vm1, %v3362_v45, %v3164_v29 }
 0x1b2   : > { %v1690_v30 = vsel %vm1673_vm5, %v1657_v63, %v1094_v20  ;;  %v1592_v28 = vsel %vm1574_vm2, %v1559_v9, %v3658_v21 }
 0x1b3   : > { %v3705_v22 = vpop.permute.xlu1 %713  ;;  %v1476_v50 = vpop.permute.xlu0 %1475  ;;  %v1625_v29 = vsel %vm1607_vm3, %v1592_v28, %v3678_v41  ;;  %v2572_v41 = vld [vmem:[%s2896_s19 + $0x168] sm:$0xff] }
 0x1b4   : > { %v1788_v8 = vsel %vm1772_vm8, %v1755_v3, %v1476_v50  ;;  %v1658_v18 = vsel %vm1640_vm4, %v1625_v29, %v968_v0 }
 0x1b5   : > { %1237 = vrot.lane.b32.xlu1 %v2570_v23, %s2849_s6  ;;  %1111 = vrot.lane.b32.xlu0 %v2633_v26, %s2848_s28 }
 0x1b6   : > { %2747 = vmatmul.mubr.msk.f32.gmra.mrb[14].mxu0 %vm1810_vm9, %v1788_v8 }
 0x1b7   : > { %v1222_v10 = vpop.permute.xlu1 %1221  ;;  %v1096_v48 = vpop.permute.xlu0 %1095 }
 0x1b8   : > { %v1723_v5 = vsel %vm1706_vm6, %v1690_v30, %v1222_v10  ;;  %v1691_v21 = vsel %vm1673_vm5, %v1658_v18, %v1096_v48  ;;  %v1560_v10 = vsel %vm1541_vm1, %v3410_v58, %v3174_v33  ;;  %v1561_v30 = vsel %vm1541_vm1, %v3425_v42, %v3172_v32  ;;  %v2606_v18 = vld [vmem:[%s2896_s19 + $0x181] sm:$0xff] }
 0x1b9   : > { %857 = vrot.lane.b32.xlu1 %v2570_v23, %s2846_s22  ;;  %731 = vrot.lane.b32.xlu0 %v2633_v26, %s2845_s21  ;;  %v1593_v48 = vsel %vm1574_vm2, %v1560_v10, %v3705_v22 }
 0x1bb   : > { %v3715_v7 = vpop.permute.xlu1 %841  ;;  %v3717_v60 = vpop.permute.xlu0 %715 }
 0x1bd   : > { %1365 = vrot.lane.b32.xlu1 %v2602_v49, %s2850_s9  ;;  %1239 = vrot.lane.b32.xlu0 %v2571_v24, %s2849_s6 }
 0x1bf   : > { %v1350_v4 = vpop.permute.xlu1 %1349  ;;  %v1224_v62 = vpop.permute.xlu0 %1223 }
 0x1c0   : > { %v1756_v52 = vsel %vm1739_vm7, %v1723_v5, %v1350_v4  ;;  %v1724_v6 = vsel %vm1706_vm6, %v1691_v21, %v1224_v62  ;;  %v1626_v4 = vsel %vm1607_vm3, %v1593_v48, %v3715_v7  ;;  %v2575_v21 = vld [vmem:[%s2896_s19 + $0x188] sm:$0xff] }
 0x1c1   : > { %985 = vrot.lane.b32.xlu1 %v2602_v49, %s2847_s23  ;;  %859 = vrot.lane.b32.xlu0 %v2571_v24, %s2846_s22  ;;  %v2636_v49 = vld [vmem:[%s2896_s19 + $0x16a] sm:$0xff] }
 0x1c2   : > { %v2605_v24 = vld [vmem:[%s2896_s19 + $0x171] sm:$0xff] }
 0x1c3   : > { %v970_v17 = vpop.permute.xlu1 %969  ;;  %v3732_v55 = vpop.permute.xlu0 %843 }
 0x1c4   : > { %v1659_v47 = vsel %vm1640_vm4, %v1626_v4, %v970_v17 }
 0x1c5   : > { %1493 = vrot.lane.b32.xlu1 %v2634_v43, %s2851_s10  ;;  %1367 = vrot.lane.b32.xlu0 %v2603_v1, %s2850_s9 }
 0x1c7   : > { %v1478_v59 = vpop.permute.xlu1 %1477  ;;  %v1352_v31 = vpop.permute.xlu0 %1351 }
 0x1c8   : > { %v1789_v44 = vsel %vm1772_vm8, %v1756_v52, %v1478_v59  ;;  %v1757_v46 = vsel %vm1739_vm7, %v1724_v6, %v1352_v31  ;;  %v1594_v52 = vsel %vm1574_vm2, %v1561_v30, %v3717_v60  ;;  %v2637_v59 = vld [vmem:[%s2896_s19 + $0x172] sm:$0xff]  ;;  %v2574_v60 = vld [vmem:[%s2896_s19 + $0x180] sm:$0xff] }
 0x1c9   : > { %v3750_v54 = vpop.f32.mrb[0].mxu0  ;;  %1113 = vrot.lane.b32.xlu1 %v2634_v43, %s2848_s28  ;;  %987 = vrot.lane.b32.xlu0 %v2603_v1, %s2847_s23  ;;  %v1627_v31 = vsel %vm1607_vm3, %v1594_v52, %v3732_v55  ;;  %v2576_v30 = vld [vmem:[%s2896_s19 + $0x198] sm:$0xff] }
 0x1ca   : > { %2137 = vst [vmem:[%s3744_s18 + $0x8] sm:$0xff] %v3750_v54  ;;  %v3758_v13 = vpop.f32.mrb[1].mxu0  ;;  %2749 = vmatprep.mubr.msk.f32.mxu1 %vm1810_vm9, %v1789_v44 }
 0x1cb   : > { %2136 = vst [vmem:[%s3744_s18] sm:$0xff] %v3758_v13  ;;  %v2168_v45 = vadd.f32 %v3750_v54, %v3758_v13  ;;  %v1098_v14 = vpop.permute.xlu1 %1097  ;;  %v972_v53 = vpop.permute.xlu0 %971 }
 0x1cc   : > { %v1692_v33 = vsel %vm1673_vm5, %v1659_v47, %v1098_v14  ;;  %v1660_v28 = vsel %vm1640_vm4, %v1627_v31, %v972_v53  ;;  %v1563_v47 = vsel %vm1541_vm1, %v3485_v56, %v3179_v34  ;;  %v2609_v31 = vld [vmem:[%s2896_s19 + $0x1a1] sm:$0xff] }
 0x1cd   : > { %733 = vrot.lane.b32.xlu1 %v2634_v43, %s2845_s21  ;;  %1495 = vrot.lane.b32.xlu0 %v2635_v16, %s2851_s10 }
 0x1cf   : > { %v3775_v26 = vpop.permute.xlu1 %717  ;;  %v1480_v2 = vpop.permute.xlu0 %1479 }
 0x1d0   : > { %v1790_v20 = vsel %vm1772_vm8, %v1757_v46, %v1480_v2 }
 0x1d1   : > { %1241 = vrot.lane.b32.xlu1 %v2572_v41, %s2849_s6  ;;  %1115 = vrot.lane.b32.xlu0 %v2635_v16, %s2848_s28 }
 0x1d2   : > { %2750 = vmatmul.mubr.msk.f32.vlgmr.msra.gmra.mrb[0].mxu1 %vm1810_vm9, %v1790_v20  ;;  %v1562_v20 = vsel %vm1541_vm1, %v3469_v38, %v3181_v35 }
 0x1d3   : > { %v1226_v0 = vpop.permute.xlu1 %1225  ;;  %v1100_v15 = vpop.permute.xlu0 %1099 }
 0x1d4   : > { %v1725_v22 = vsel %vm1706_vm6, %v1692_v33, %v1226_v0  ;;  %v1693_v32 = vsel %vm1673_vm5, %v1660_v28, %v1100_v15  ;;  %v1595_v0 = vsel %vm1574_vm2, %v1562_v20, %v3775_v26  ;;  %v2638_v15 = vld [vmem:[%s2896_s19 + $0x182] sm:$0xff] }
 0x1d5   : > { %861 = vrot.lane.b32.xlu1 %v2572_v41, %s2846_s22  ;;  %735 = vrot.lane.b32.xlu0 %v2635_v16, %s2845_s21 }
 0x1d7   : > { %v3785_v23 = vpop.permute.xlu1 %845  ;;  %v3787_v3 = vpop.permute.xlu0 %719 }
 0x1d9   : > { %1369 = vrot.lane.b32.xlu1 %v2604_v40, %s2850_s9  ;;  %1243 = vrot.lane.b32.xlu0 %v2573_v27, %s2849_s6 }
 0x1db   : > { %v1354_v50 = vpop.permute.xlu1 %1353  ;;  %v1228_v8 = vpop.permute.xlu0 %1227 }
 0x1dc   : > { %v1758_v7 = vsel %vm1739_vm7, %v1725_v22, %v1354_v50  ;;  %v1726_v42 = vsel %vm1706_vm6, %v1693_v32, %v1228_v8  ;;  %v1596_v22 = vsel %vm1574_vm2, %v1563_v47, %v3787_v3  ;;  %v2641_v32 = vld [vmem:[%s2896_s19 + $0x1a2] sm:$0xff] }
 0x1dd   : > { %989 = vrot.lane.b32.xlu1 %v2604_v40, %s2847_s23  ;;  %863 = vrot.lane.b32.xlu0 %v2573_v27, %s2846_s22  ;;  %v2607_v40 = vld [vmem:[%s2896_s19 + $0x189] sm:$0xff]  ;;  %v1628_v27 = vsel %vm1607_vm3, %v1595_v0, %v3785_v23 }
 0x1df   : > { %v974_v62 = vpop.permute.xlu1 %973  ;;  %v3802_v19 = vpop.permute.xlu0 %847 }
 0x1e0   : > { %v1661_v10 = vsel %vm1640_vm4, %v1628_v27, %v974_v62 }
 0x1e1   : > { %v3806_v58 = vpop.f32.mrb[2].mxu0  ;;  %1497 = vrot.lane.b32.xlu1 %v2636_v49, %s2851_s10  ;;  %1371 = vrot.lane.b32.xlu0 %v2605_v24, %s2850_s9 }
 0x1e2   : > { %2139 = vst [vmem:[%s3744_s18 + $0x18] sm:$0xff] %v3806_v58  ;;  %v3813_v43 = vpop.f32.mrb[3].mxu0 }
 0x1e3   : > { %2138 = vst [vmem:[%s3744_s18 + $0x10] sm:$0xff] %v3813_v43  ;;  %v2169_v1 = vadd.f32 %v2168_v45, %v3813_v43  ;;  %v1482_v25 = vpop.permute.xlu1 %1481  ;;  %v1356_v17 = vpop.permute.xlu0 %1355 }
 0x1e4   : > { %v1791_v63 = vsel %vm1772_vm8, %v1758_v7, %v1482_v25  ;;  %v1759_v16 = vsel %vm1739_vm7, %v1726_v42, %v1356_v17  ;;  %v2545_v7 = vld [vmem:[%s2896_s19 + $0x18a] sm:$0xff]  ;;  %v2640_v42 = vld [vmem:[%s2896_s19 + $0x19a] sm:$0xff] }
 0x1e5   : > { %1117 = vrot.lane.b32.xlu1 %v2636_v49, %s2848_s28  ;;  %991 = vrot.lane.b32.xlu0 %v2605_v24, %s2847_s23  ;;  %v2170_v5 = vadd.f32 %v3806_v58, %v2169_v1  ;;  %v1629_v1 = vsel %vm1607_vm3, %v1596_v22, %v3802_v19 }
 0x1e6   : > { %2752 = vmatprep.mubr.msk.f32.mxu1 %vm1810_vm9, %v1791_v63  ;;  %v2577_v63 = vld [vmem:[%s2896_s19 + $0x1a0] sm:$0xff] }
 0x1e7   : > { %v1102_v44 = vpop.permute.xlu1 %1101  ;;  %v976_v9 = vpop.permute.xlu0 %975 }
 0x1e8   : > { %v1694_v35 = vsel %vm1673_vm5, %v1661_v10, %v1102_v44  ;;  %v1662_v34 = vsel %vm1640_vm4, %v1629_v1, %v976_v9  ;;  %v2608_v44 = vld [vmem:[%s2896_s19 + $0x199] sm:$0xff] }
 0x1e9   : > { %737 = vrot.lane.b32.xlu1 %v2636_v49, %s2845_s21  ;;  %1499 = vrot.lane.b32.xlu0 %v2637_v59, %s2851_s10 }
 0x1eb   : > { %v3839_v29 = vpop.permute.xlu1 %721  ;;  %v1484_v55 = vpop.permute.xlu0 %1483 }
 0x1ec   : > { %v1792_v45 = vsel %vm1772_vm8, %v1759_v16, %v1484_v55 }
 0x1ed   : > { %1245 = vrot.lane.b32.xlu1 %v2574_v60, %s2849_s6  ;;  %1119 = vrot.lane.b32.xlu0 %v2637_v59, %s2848_s28 }
 0x1ee   : > { %2753 = vmatmul.mubr.msk.f32.gmra.mrb[2].mxu1 %vm1810_vm9, %v1792_v45 }
 0x1ef   : > { %v1230_v14 = vpop.permute.xlu1 %1229  ;;  %v1104_v53 = vpop.permute.xlu0 %1103 }
 0x1f0   : > { %v1727_v26 = vsel %vm1706_vm6, %v1694_v35, %v1230_v14  ;;  %v1695_v56 = vsel %vm1673_vm5, %v1662_v34, %v1104_v53  ;;  %v1564_v14 = vsel %vm1541_vm1, %v3527_v51, %v3189_v37 }
 0x1f1   : > { %865 = vrot.lane.b32.xlu1 %v2574_v60, %s2846_s22  ;;  %739 = vrot.lane.b32.xlu0 %v2637_v59, %s2845_s21  ;;  %v1597_v53 = vsel %vm1574_vm2, %v1564_v14, %v3839_v29 }
 0x1f3   : > { %v3849_v6 = vpop.permute.xlu1 %849  ;;  %v3851_v41 = vpop.permute.xlu0 %723 }
 0x1f5   : > { %1373 = vrot.lane.b32.xlu1 %v2606_v18, %s2850_s9  ;;  %1247 = vrot.lane.b32.xlu0 %v2575_v21, %s2849_s6 }
 0x1f7   : > { %v1358_v46 = vpop.permute.xlu1 %1357  ;;  %v1232_v2 = vpop.permute.xlu0 %1231 }
 0x1f8   : > { %v1760_v23 = vsel %vm1739_vm7, %v1727_v26, %v1358_v46  ;;  %v1728_v3 = vsel %vm1706_vm6, %v1695_v56, %v1232_v2 }
 0x1f9   : > { %993 = vrot.lane.b32.xlu1 %v2606_v18, %s2847_s23  ;;  %867 = vrot.lane.b32.xlu0 %v2575_v21, %s2846_s22  ;;  %v1630_v18 = vsel %vm1607_vm3, %v1597_v53, %v3849_v6 }
 0x1fb   : > { %v978_v50 = vpop.permute.xlu1 %977  ;;  %v3866_v8 = vpop.permute.xlu0 %851 }
 0x1fc   : > { %v1663_v2 = vsel %vm1640_vm4, %v1630_v18, %v978_v50  ;;  %v1565_v50 = vsel %vm1541_vm1, %v3543_v39, %v3187_v36 }
 0x1fd   : > { %v3870_v38 = vpop.f32.mrb[4].mxu0  ;;  %1501 = vrot.lane.b32.xlu1 %v2638_v15, %s2851_s10  ;;  %1375 = vrot.lane.b32.xlu0 %v2607_v40, %s2850_s9  ;;  %v1598_v35 = vsel %vm1574_vm2, %v1565_v50, %v3851_v41 }
 0x1fe   : > { %2141 = vst [vmem:[%s3744_s18 + $0x28] sm:$0xff] %v3870_v38  ;;  %v3877_v48 = vpop.f32.mrb[5].mxu0  ;;  %v1631_v26 = vsel %vm1607_vm3, %v1598_v35, %v3866_v8 }
 0x1ff   : > { %2140 = vst [vmem:[%s3744_s18 + $0x20] sm:$0xff] %v3877_v48  ;;  %v2171_v49 = vadd.f32 %v2170_v5, %v3877_v48  ;;  %v1486_v24 = vpop.permute.xlu1 %1485  ;;  %v1360_v4 = vpop.permute.xlu0 %1359 }
 0x200   : > { %v1793_v62 = vsel %vm1772_vm8, %v1760_v23, %v1486_v24  ;;  %v1761_v19 = vsel %vm1739_vm7, %v1728_v3, %v1360_v4 }
 0x201   : > { %1121 = vrot.lane.b32.xlu1 %v2638_v15, %s2848_s28  ;;  %995 = vrot.lane.b32.xlu0 %v2607_v40, %s2847_s23  ;;  %v2172_v33 = vadd.f32 %v3870_v38, %v2171_v49 }
 0x202   : > { %2755 = vmatprep.mubr.msk.f32.mxu1 %vm1810_vm9, %v1793_v62 }
 0x203   : > { %v1106_v25 = vpop.permute.xlu1 %1105  ;;  %v980_v17 = vpop.permute.xlu0 %979 }
 0x204   : > { %v1696_v20 = vsel %vm1673_vm5, %v1663_v2, %v1106_v25  ;;  %v1664_v24 = vsel %vm1640_vm4, %v1631_v26, %v980_v17  ;;  %v4261_v17 = vld [vmem:[#allocation3_spill] sm:$0xff] }
 0x205   : > { %1123 = vrot.lane.b32.xlu1 %v2545_v7, %s2848_s28  ;;  %1503 = vrot.lane.b32.xlu0 %v2545_v7, %s2851_s10  ;;  %v1566_v34 = vsel %vm1541_vm1, %v3585_v12, %v4261_v17 }
 0x207   : > { %v726_v5 = vpop.permute.xlu1 %725  ;;  %v1488_v52 = vpop.permute.xlu0 %1487 }
 0x208   : > { %v1794_v59 = vsel %vm1772_vm8, %v1761_v19, %v1488_v52  ;;  %v1599_v56 = vsel %vm1574_vm2, %v1566_v34, %v726_v5 }
 0x209   : > { %1251 = vrot.lane.b32.xlu1 %v2577_v63, %s2849_s6  ;;  %1249 = vrot.lane.b32.xlu0 %v2576_v30, %s2849_s6 }
 0x20a   : > { %2756 = vmatmul.mubr.msk.f32.gmra.mrb[4].mxu1 %vm1810_vm9, %v1794_v59 }
 0x20b   : > { %v1234_v9 = vpop.permute.xlu1 %1233  ;;  %v1108_v28 = vpop.permute.xlu0 %1107 }
 0x20c   : > { %v1729_v15 = vsel %vm1706_vm6, %v1696_v20, %v1234_v9  ;;  %v1697_v4 = vsel %vm1673_vm5, %v1664_v24, %v1108_v28 }
 0x20d   : > { %1379 = vrot.lane.b32.xlu1 %v2609_v31, %s2850_s9  ;;  %1377 = vrot.lane.b32.xlu0 %v2608_v44, %s2850_s9 }
 0x20f   : > { %v854_v60 = vpop.permute.xlu1 %853  ;;  %v3914_v16 = vpop.permute.xlu0 %727 }
 0x210   : > { %v1632_v3 = vsel %vm1607_vm3, %v1599_v56, %v854_v60 }
 0x211   : > { %1507 = vrot.lane.b32.xlu1 %v2641_v32, %s2851_s10  ;;  %1505 = vrot.lane.b32.xlu0 %v2640_v42, %s2851_s10  ;;  %v4262_v42 = vld [vmem:[#allocation2_spill] sm:$0xff] }
 0x212   : > { %v1567_v60 = vsel %vm1541_vm1, %v3601_v57, %v4262_v42  ;;  %v255_v42 = vld [vmem:[%s2896_s19 + $0x150] sm:$0xff] }
 0x213   : > { %v1362_v55 = vpop.permute.xlu1 %1361  ;;  %v1236_v45 = vpop.permute.xlu0 %1235 }
 0x214   : > { %v1762_v37 = vsel %vm1739_vm7, %v1729_v15, %v1362_v55  ;;  %v1730_v62 = vsel %vm1706_vm6, %v1697_v4, %v1236_v45  ;;  %v1600_v45 = vsel %vm1574_vm2, %v1567_v60, %v3914_v16 }
 0x217   : > { %v982_v21 = vpop.permute.xlu1 %981  ;;  %v856_v46 = vpop.permute.xlu0 %855 }
 0x218   : > { %v1665_v19 = vsel %vm1640_vm4, %v1632_v3, %v982_v21  ;;  %v1633_v14 = vsel %vm1607_vm3, %v1600_v45, %v856_v46  ;;  %v4265_v45 = vld [vmem:[#allocation7_spill] sm:$0xff] }
 0x219   : > { %v3927_v0 = vpop.f32.mrb[6].mxu0 }
 0x21a   : > { %2143 = vst [vmem:[%s3744_s18 + $0x38] sm:$0xff] %v3927_v0  ;;  %v3932_v40 = vpop.f32.mrb[7].mxu0 }
 0x21b   : > { %2142 = vst [vmem:[%s3744_s18 + $0x30] sm:$0xff] %v3932_v40  ;;  %v2173_v51 = vadd.f32 %v2172_v33, %v3932_v40  ;;  %v1490_v29 = vpop.permute.xlu1 %1489  ;;  %v1364_v6 = vpop.permute.xlu0 %1363 }
 0x21c   : > { %v1795_v27 = vsel %vm1772_vm8, %v1762_v37, %v1490_v29  ;;  %v1763_v36 = vsel %vm1739_vm7, %v1730_v62, %v1364_v6 }
 0x21d   : > { %2758 = vmatprep.mubr.msk.f32.mxu1 %vm1810_vm9, %v1795_v27  ;;  %v2174_v10 = vadd.f32 %v3927_v0, %v2173_v51 }
 0x21f   : > { %v1110_v23 = vpop.permute.xlu1 %1109  ;;  %v984_v49 = vpop.permute.xlu0 %983 }
 0x220   : > { %v1698_v52 = vsel %vm1673_vm5, %v1665_v19, %v1110_v23  ;;  %v1666_v21 = vsel %vm1640_vm4, %v1633_v14, %v984_v49  ;;  %v1570_v14 = vsel %vm1541_vm1, %v255_v42, %v4265_v45 }
 0x223   : > { %v730_v39 = vpop.permute.xlu1 %729  ;;  %v1492_v47 = vpop.permute.xlu0 %1491 }
 0x224   : > { %v1796_v33 = vsel %vm1772_vm8, %v1763_v36, %v1492_v47 }
 0x225   : > { %2759 = vmatmul.mubr.msk.f32.gmra.mrb[6].mxu1 %vm1810_vm9, %v1796_v33 }
 0x227   : > { %v1238_v41 = vpop.permute.xlu1 %1237  ;;  %v1112_v22 = vpop.permute.xlu0 %1111 }
 0x228   : > { %v1731_v31 = vsel %vm1706_vm6, %v1698_v52, %v1238_v41  ;;  %v1699_v2 = vsel %vm1673_vm5, %v1666_v21, %v1112_v22 }
 0x22b   : > { %v858_v8 = vpop.permute.xlu1 %857  ;;  %v732_v7 = vpop.permute.xlu0 %731 }
 0x22f   : > { %v1366_v1 = vpop.permute.xlu1 %1365  ;;  %v1240_v25 = vpop.permute.xlu0 %1239 }
 0x230   : > { %v1764_v12 = vsel %vm1739_vm7, %v1731_v31, %v1366_v1  ;;  %v1732_v20 = vsel %vm1706_vm6, %v1699_v2, %v1240_v25  ;;  %v4264_v1 = vld [vmem:[#allocation4_spill] sm:$0xff] }
 0x231   : > { %v1569_v25 = vsel %vm1541_vm1, %v3661_v61, %v4264_v1 }
 0x232   : > { %v1602_v34 = vsel %vm1574_vm2, %v1569_v25, %v732_v7 }
 0x233   : > { %v986_v63 = vpop.permute.xlu1 %985  ;;  %v860_v30 = vpop.permute.xlu0 %859 }
 0x234   : > { %v1635_v56 = vsel %vm1607_vm3, %v1602_v34, %v860_v30 }
 0x235   : > { %v3961_v59 = vpop.f32.mrb[8].mxu0 }
 0x236   : > { %2145 = vst [vmem:[%s3744_s18 + $0x48] sm:$0xff] %v3961_v59  ;;  %v3966_v44 = vpop.f32.mrb[9].mxu0 }
 0x237   : > { %2144 = vst [vmem:[%s3744_s18 + $0x40] sm:$0xff] %v3966_v44  ;;  %v2175_v5 = vadd.f32 %v2174_v10, %v3966_v44  ;;  %v1494_v9 = vpop.permute.xlu1 %1493  ;;  %v1368_v28 = vpop.permute.xlu0 %1367  ;;  %v4263_v10 = vld [vmem:[#allocation5_spill] sm:$0xff] }
 0x238   : > { %v1797_v32 = vsel %vm1772_vm8, %v1764_v12, %v1494_v9  ;;  %v1765_v15 = vsel %vm1739_vm7, %v1732_v20, %v1368_v28  ;;  %v1568_v35 = vsel %vm1541_vm1, %v3645_v11, %v4263_v10 }
 0x239   : > { %2761 = vmatprep.mubr.msk.f32.mxu1 %vm1810_vm9, %v1797_v32  ;;  %v2176_v55 = vadd.f32 %v3961_v59, %v2175_v5  ;;  %v1601_v26 = vsel %vm1574_vm2, %v1568_v35, %v730_v39  ;;  %v4266_v35 = vld [vmem:[#allocation6_spill] sm:$0xff] }
 0x23a   : > { %v1634_v23 = vsel %vm1607_vm3, %v1601_v26, %v858_v8 }
 0x23b   : > { %v1114_v53 = vpop.permute.xlu1 %1113  ;;  %v988_v18 = vpop.permute.xlu0 %987  ;;  %v1667_v4 = vsel %vm1640_vm4, %v1634_v23, %v986_v63 }
 0x23c   : > { %v1700_v62 = vsel %vm1673_vm5, %v1667_v4, %v1114_v53  ;;  %v1668_v19 = vsel %vm1640_vm4, %v1635_v56, %v988_v18  ;;  %v4267_v56 = vld [vmem:[#allocation8_spill] sm:$0xff] }
 0x23f   : > { %v734_v57 = vpop.permute.xlu1 %733  ;;  %v1496_v37 = vpop.permute.xlu0 %1495 }
 0x240   : > { %v1798_v51 = vsel %vm1772_vm8, %v1765_v15, %v1496_v37  ;;  %v1603_v53 = vsel %vm1574_vm2, %v1570_v14, %v734_v57 }
 0x241   : > { %2762 = vmatmul.mubr.msk.f32.gmra.mrb[8].mxu1 %vm1810_vm9, %v1798_v51  ;;  %v256_v51 = vld [vmem:[%s2896_s19 + $0x158] sm:$0xff] }
 0x242   : > { %v1571_v26 = vsel %vm1541_vm1, %v256_v51, %v4266_v35 }
 0x243   : > { %v1242_v16 = vpop.permute.xlu1 %1241  ;;  %v1116_v29 = vpop.permute.xlu0 %1115 }
 0x244   : > { %v1733_v47 = vsel %vm1706_vm6, %v1700_v62, %v1242_v16  ;;  %v1701_v52 = vsel %vm1673_vm5, %v1668_v19, %v1116_v29 }
 0x247   : > { %v862_v46 = vpop.permute.xlu1 %861  ;;  %v3987_v6 = vpop.permute.xlu0 %735 }
 0x248   : > { %v1636_v18 = vsel %vm1607_vm3, %v1603_v53, %v862_v46 }
 0x24b   : > { %v1370_v27 = vpop.permute.xlu1 %1369  ;;  %v1244_v50 = vpop.permute.xlu0 %1243 }
 0x24c   : > { %v1766_v11 = vsel %vm1739_vm7, %v1733_v47, %v1370_v27  ;;  %v1734_v31 = vsel %vm1706_vm6, %v1701_v52, %v1244_v50 }
 0x24f   : > { %v990_v49 = vpop.permute.xlu1 %989  ;;  %v864_v24 = vpop.permute.xlu0 %863 }
 0x250   : > { %v1669_v20 = vsel %vm1640_vm4, %v1636_v18, %v990_v49  ;;  %v1604_v49 = vsel %vm1574_vm2, %v1571_v26, %v3987_v6  ;;  %v257_v6 = vld [vmem:[%s2896_s19 + $0x168] sm:$0xff] }
 0x251   : > { %v3996_v36 = vpop.f32.mrb[10].mxu0  ;;  %v1637_v4 = vsel %vm1607_vm3, %v1604_v49, %v864_v24 }
 0x252   : > { %2147 = vst [vmem:[%s3744_s18 + $0x58] sm:$0xff] %v3996_v36  ;;  %v4001_v33 = vpop.f32.mrb[11].mxu0 }
 0x253   : > { %2146 = vst [vmem:[%s3744_s18 + $0x50] sm:$0xff] %v4001_v33  ;;  %v2177_v39 = vadd.f32 %v2176_v55, %v4001_v33  ;;  %v1498_v41 = vpop.permute.xlu1 %1497  ;;  %v1372_v22 = vpop.permute.xlu0 %1371 }
 0x254   : > { %v1799_v8 = vsel %vm1772_vm8, %v1766_v11, %v1498_v41  ;;  %v1767_v12 = vsel %vm1739_vm7, %v1734_v31, %v1372_v22 }
 0x255   : > { %2764 = vmatprep.mubr.msk.f32.mxu1 %vm1810_vm9, %v1799_v8  ;;  %v2178_v17 = vadd.f32 %v3996_v36, %v2177_v39 }
 0x257   : > { %v1118_v3 = vpop.permute.xlu1 %1117  ;;  %v992_v63 = vpop.permute.xlu0 %991 }
 0x258   : > { %v1702_v15 = vsel %vm1673_vm5, %v1669_v20, %v1118_v3  ;;  %v1670_v11 = vsel %vm1640_vm4, %v1637_v4, %v992_v63  ;;  %v4268_v63 = vld [vmem:[#allocation9_spill] sm:$0xff] }
 0x259   : > { %v1572_v19 = vsel %vm1541_vm1, %v257_v6, %v4268_v63 }
 0x25b   : > { %v738_v61 = vpop.permute.xlu1 %737  ;;  %v1500_v5 = vpop.permute.xlu0 %1499 }
 0x25c   : > { %v1800_v9 = vsel %vm1772_vm8, %v1767_v12, %v1500_v5  ;;  %v1605_v52 = vsel %vm1574_vm2, %v1572_v19, %v738_v61 }
 0x25d   : > { %2765 = vmatmul.mubr.msk.f32.gmra.mrb[10].mxu1 %vm1810_vm9, %v1800_v9 }
 0x25f   : > { %v1246_v7 = vpop.permute.xlu1 %1245  ;;  %v1120_v28 = vpop.permute.xlu0 %1119 }
 0x260   : > { %v1735_v16 = vsel %vm1706_vm6, %v1702_v15, %v1246_v7  ;;  %v1703_v39 = vsel %vm1673_vm5, %v1670_v11, %v1120_v28 }
 0x263   : > { %v866_v30 = vpop.permute.xlu1 %865  ;;  %v740_v32 = vpop.permute.xlu0 %739 }
 0x264   : > { %v1638_v12 = vsel %vm1607_vm3, %v1605_v52, %v866_v30 }
 0x267   : > { %v1374_v60 = vpop.permute.xlu1 %1373  ;;  %v1248_v55 = vpop.permute.xlu0 %1247 }
 0x268   : > { %v1768_v27 = vsel %vm1739_vm7, %v1735_v16, %v1374_v60  ;;  %v1736_v41 = vsel %vm1706_vm6, %v1703_v39, %v1248_v55 }
 0x26b   : > { %v994_v21 = vpop.permute.xlu1 %993  ;;  %v868_v2 = vpop.permute.xlu0 %867 }
 0x26c   : > { %v1671_v28 = vsel %vm1640_vm4, %v1638_v12, %v994_v21 }
 0x26d   : > { %v4028_v37 = vpop.f32.mrb[12].mxu0 }
 0x26e   : > { %2149 = vst [vmem:[%s3744_s18 + $0x68] sm:$0xff] %v4028_v37  ;;  %v4034_v29 = vpop.f32.mrb[13].mxu0 }
 0x26f   : > { %2148 = vst [vmem:[%s3744_s18 + $0x60] sm:$0xff] %v4034_v29  ;;  %v2179_v57 = vadd.f32 %v2178_v17, %v4034_v29  ;;  %v1502_v46 = vpop.permute.xlu1 %1501  ;;  %v1376_v50 = vpop.permute.xlu0 %1375  ;;  %v258_v17 = vld [vmem:[%s2896_s19 + $0x170] sm:$0xff]  ;;  %s2449_s19 = sshll.u32 %s4274_s12, 1 }
 0x270   : > { %v1801_v10 = vsel %vm1772_vm8, %v1768_v27, %v1502_v46  ;;  %v1769_v22 = vsel %vm1739_vm7, %v1736_v41, %v1376_v50  ;;  %v1573_v3 = vsel %vm1541_vm1, %v258_v17, %v4267_v56  ;;  %s226_s22 = scalar_lea.vmem %s4252_s3, %s2449_s19 }
 0x271   : > { %2767 = vmatprep.mubr.msk.f32.mxu1 %vm1810_vm9, %v1801_v10  ;;  %v2180_v23 = vadd.f32 %v4028_v37, %v2179_v57  ;;  %v1606_v31 = vsel %vm1574_vm2, %v1573_v3, %v740_v32 }
 0x272   : > { %v1639_v5 = vsel %vm1607_vm3, %v1606_v31, %v868_v2 }
 0x273   : > { %v1122_v62 = vpop.permute.xlu1 %1121  ;;  %v996_v47 = vpop.permute.xlu0 %995 }
 0x274   : > { %v1672_v42 = vsel %vm1640_vm4, %v1639_v5, %v996_v47  ;;  %v1704_v60 = vsel %vm1673_vm5, %v1671_v28, %v1122_v62 }
 0x277   : > { %v1124_v8 = vpop.permute.xlu1 %1123  ;;  %v1504_v1 = vpop.permute.xlu0 %1503 }
 0x278   : > { %v1802_v25 = vsel %vm1772_vm8, %v1769_v22, %v1504_v1  ;;  %v1705_v55 = vsel %vm1673_vm5, %v1672_v42, %v1124_v8 }
 0x279   : > { %2768 = vmatmul.mubr.msk.f32.gmra.mrb[12].mxu1 %vm1810_vm9, %v1802_v25 }
 0x27b   : > { %v1252_v34 = vpop.permute.xlu1 %1251  ;;  %v1250_v24 = vpop.permute.xlu0 %1249 }
 0x27c   : > { %v1738_v61 = vsel %vm1706_vm6, %v1705_v55, %v1252_v34  ;;  %v1737_v32 = vsel %vm1706_vm6, %v1704_v60, %v1250_v24 }
 0x27f   : > { %v1380_v9 = vpop.permute.xlu1 %1379  ;;  %v1378_v7 = vpop.permute.xlu0 %1377 }
 0x280   : > { %v1771_v30 = vsel %vm1739_vm7, %v1738_v61, %v1380_v9  ;;  %v1770_v45 = vsel %vm1739_vm7, %v1737_v32, %v1378_v7 }
 0x283   : > { %v1508_v14 = vpop.permute.xlu1 %1507  ;;  %v1506_v53 = vpop.permute.xlu0 %1505 }
 0x284   : > { %v1804_v18 = vsel %vm1772_vm8, %v1771_v30, %v1508_v14  ;;  %v1803_v21 = vsel %vm1772_vm8, %v1770_v45, %v1506_v53 }
 0x285   : > { %2770 = vmatprep.mubr.msk.f32.mxu1 %vm1810_vm9, %v1803_v21 }
 0x286   : > { %2771 = vmatmul.mubr.msk.f32.gmra.mrb[14].mxu1 %vm1810_vm9, %v1804_v18 }
 0x289   : > { %v4076_v2 = vpop.f32.mrb[14].mxu0 }
 0x28a   : > { %2151 = vst [vmem:[%s3744_s18 + $0x78] sm:$0xff] %v4076_v2  ;;  %v4080_v20 = vpop.f32.mrb[15].mxu0 }
 0x28b   : > { %2150 = vst [vmem:[%s3744_s18 + $0x70] sm:$0xff] %v4080_v20  ;;  %v2181_v15 = vadd.f32 %v2180_v23, %v4080_v20 }
 0x28d   : > { %v2182_v51 = vadd.f32 %v4076_v2, %v2181_v15 }
 0x2a5   : > { %v4086_v16 = vpop.f32.mrb[0].mxu1 }
 0x2a6   : > { %2153 = vst [vmem:[%s3744_s18 + $0x88] sm:$0xff] %v4086_v16  ;;  %v4090_v27 = vpop.f32.mrb[1].mxu1 }
 0x2a7   : > { %2152 = vst [vmem:[%s3744_s18 + $0x80] sm:$0xff] %v4090_v27  ;;  %v2183_v57 = vadd.f32 %v2182_v51, %v4090_v27 }
 0x2a9   : > { %v2184_v46 = vadd.f32 %v4086_v16, %v2183_v57 }
 0x2c1   : > { %v4096_v50 = vpop.f32.mrb[2].mxu1 }
 0x2c2   : > { %2155 = vst [vmem:[%s3744_s18 + $0x98] sm:$0xff] %v4096_v50  ;;  %v4100_v10 = vpop.f32.mrb[3].mxu1 }
 0x2c3   : > { %2154 = vst [vmem:[%s3744_s18 + $0x90] sm:$0xff] %v4100_v10  ;;  %v2185_v35 = vadd.f32 %v2184_v46, %v4100_v10 }
 0x2c5   : > { %v2186_v26 = vadd.f32 %v4096_v50, %v2185_v35 }
 0x2dd   : > { %v4106_v23 = vpop.f32.mrb[4].mxu1 }
 0x2de   : > { %2157 = vst [vmem:[%s3744_s18 + $0xa8] sm:$0xff] %v4106_v23  ;;  %v4110_v49 = vpop.f32.mrb[5].mxu1 }
 0x2df   : > { %2156 = vst [vmem:[%s3744_s18 + $0xa0] sm:$0xff] %v4110_v49  ;;  %v2187_v4 = vadd.f32 %v2186_v26, %v4110_v49 }
 0x2e1   : > { %v2188_v62 = vadd.f32 %v4106_v23, %v2187_v4 }
 0x2f8   : > { %v4116_v47 = vpop.f32.mrb[6].mxu1 }
 0x2f9   : > { %2159 = vst [vmem:[%s3744_s18 + $0xb8] sm:$0xff] %v4116_v47  ;;  %v4120_v11 = vpop.f32.mrb[7].mxu1 }
 0x2fa   : > { %2158 = vst [vmem:[%s3744_s18 + $0xb0] sm:$0xff] %v4120_v11  ;;  %v2189_v39 = vadd.f32 %v2188_v62, %v4120_v11 }
 0x2fc   : > { %v2190_v41 = vadd.f32 %v4116_v47, %v2189_v39 }
 0x314   : > { %v4126_v22 = vpop.f32.mrb[8].mxu1 }
 0x315   : > { %2161 = vst [vmem:[%s3744_s18 + $0xc8] sm:$0xff] %v4126_v22  ;;  %v4130_v8 = vpop.f32.mrb[9].mxu1 }
 0x316   : > { %2160 = vst [vmem:[%s3744_s18 + $0xc0] sm:$0xff] %v4130_v8  ;;  %v2191_v1 = vadd.f32 %v2190_v41, %v4130_v8 }
 0x318   : > { %v2192_v25 = vadd.f32 %v4126_v22, %v2191_v1 }
 0x330   : > { %v4136_v17 = vpop.f32.mrb[10].mxu1 }
 0x331   : > { %2163 = vst [vmem:[%s3744_s18 + $0xd8] sm:$0xff] %v4136_v17  ;;  %v4140_v6 = vpop.f32.mrb[11].mxu1 }
 0x332   : > { %2162 = vst [vmem:[%s3744_s18 + $0xd0] sm:$0xff] %v4140_v6  ;;  %v2193_v34 = vadd.f32 %v2192_v25, %v4140_v6 }
 0x334   : > { %v2194_v24 = vadd.f32 %v4136_v17, %v2193_v34 }
 0x34c   : > { %v4146_v56 = vpop.f32.mrb[12].mxu1 }
 0x34d   : > { %2165 = vst [vmem:[%s3744_s18 + $0xe8] sm:$0xff] %v4146_v56  ;;  %v4150_v3 = vpop.f32.mrb[13].mxu1 }
 0x34e   : > { %2164 = vst [vmem:[%s3744_s18 + $0xe0] sm:$0xff] %v4150_v3  ;;  %v2195_v63 = vadd.f32 %v2194_v24, %v4150_v3 }
 0x350   : > { %v2196_v19 = vadd.f32 %v4146_v56, %v2195_v63 }
 0x359   : > { %v4156_v52 = vpop.f32.mrb[14].mxu1 }
 0x35a   : > { %2167 = vst [vmem:[%s3744_s18 + $0xf8] sm:$0xff] %v4156_v52  ;;  %v4160_v31 = vpop.f32.mrb[15].mxu1 }
 0x35b   : > { %2166 = vst [vmem:[%s3744_s18 + $0xf0] sm:$0xff] %v4160_v31  ;;  %v2197_v12 = vadd.f32 %v2196_v19, %v4160_v31 }
 0x35d   : > { %v2198_v5 = vadd.f32 %v4156_v52, %v2197_v12 }
 0x35f   : > { %v2199_v9 = vrot.slane %v2198_v5, 4 }
 0x361   : > { %v2200_v7 = vadd.f32 %v2199_v9, %v2198_v5 }
 0x363   : > { %v2201_v28 = vrot.slane %v2200_v7, 2 }
 0x365   : > { %v2202_v42 = vadd.f32 %v2201_v28, %v2200_v7 }
 0x367   : > { %v2203_v60 = vrot.slane %v2202_v42, 1 }
 0x369   : > { %v4166_v55 = vadd.f32 %v2203_v60, %v2202_v42 }
 0x36b   : > { %v4169_v61 = vmul.f32 0.00390625, %v4166_v55 }
 0x36d   : > { %v2206_v32 = vsub.f32 %v3758_v13, %v4169_v61  ;;  %v2207_v30 = vsub.f32 %v3750_v54, %v4169_v61  ;;  %v2208_v45 = vsub.f32 %v3813_v43, %v4169_v61  ;;  %v2209_v18 = vsub.f32 %v3806_v58, %v4169_v61 }
 0x36e   : > { %v2210_v21 = vsub.f32 %v3877_v48, %v4169_v61  ;;  %v2211_v57 = vsub.f32 %v3870_v38, %v4169_v61  ;;  %v2212_v54 = vsub.f32 %v3932_v40, %v4169_v61  ;;  %v2213_v26 = vsub.f32 %v3927_v0, %v4169_v61 }
 0x36f   : > { %v2238_v14 = vmul.f32 %v2206_v32, %v2206_v32  ;;  %v2239_v53 = vmul.f32 %v2207_v30, %v2207_v30  ;;  %v2240_v15 = vmul.f32 %v2208_v45, %v2208_v45  ;;  %v2241_v13 = vmul.f32 %v2209_v18, %v2209_v18 }
 0x370   : > { %v2242_v35 = vmul.f32 %v2210_v21, %v2210_v21  ;;  %v2243_v4 = vmul.f32 %v2211_v57, %v2211_v57  ;;  %v2214_v48 = vsub.f32 %v3966_v44, %v4169_v61  ;;  %v2244_v62 = vmul.f32 %v2212_v54, %v2212_v54 }
 0x371   : > { %v2270_v51 = vadd.f32 %v2239_v53, %v2238_v14  ;;  %v2215_v38 = vsub.f32 %v3961_v59, %v4169_v61  ;;  %v2245_v41 = vmul.f32 %v2213_v26, %v2213_v26  ;;  %v2216_v40 = vsub.f32 %v4001_v33, %v4169_v61 }
 0x372   : > { %v2246_v25 = vmul.f32 %v2214_v48, %v2214_v48  ;;  %v2217_v0 = vsub.f32 %v3996_v36, %v4169_v61  ;;  %v2218_v44 = vsub.f32 %v4034_v29, %v4169_v61  ;;  %v2219_v59 = vsub.f32 %v4028_v37, %v4169_v61 }
 0x373   : > { %v2271_v46 = vadd.f32 %v2270_v51, %v2240_v15  ;;  %v2247_v24 = vmul.f32 %v2215_v38, %v2215_v38  ;;  %v2248_v19 = vmul.f32 %v2216_v40, %v2216_v40  ;;  %v2220_v33 = vsub.f32 %v4080_v20, %v4169_v61 }
 0x374   : > { %v2249_v5 = vmul.f32 %v2217_v0, %v2217_v0  ;;  %v2250_v7 = vmul.f32 %v2218_v44, %v2218_v44  ;;  %v2221_v36 = vsub.f32 %v4076_v2, %v4169_v61  ;;  %v2251_v42 = vmul.f32 %v2219_v59, %v2219_v59 }
 0x375   : > { %v2272_v43 = vadd.f32 %v2271_v46, %v2241_v13  ;;  %v2222_v29 = vsub.f32 %v4090_v27, %v4169_v61  ;;  %v2252_v32 = vmul.f32 %v2220_v33, %v2220_v33  ;;  %v2223_v37 = vsub.f32 %v4086_v16, %v4169_v61 }
 0x376   : > { %v2253_v45 = vmul.f32 %v2221_v36, %v2221_v36  ;;  %v2224_v20 = vsub.f32 %v4100_v10, %v4169_v61  ;;  %v2225_v2 = vsub.f32 %v4096_v50, %v4169_v61  ;;  %v2226_v27 = vsub.f32 %v4110_v49, %v4169_v61 }
 0x377   : > { %v2273_v58 = vadd.f32 %v2272_v43, %v2242_v35  ;;  %v2254_v53 = vmul.f32 %v2222_v29, %v2222_v29  ;;  %v2255_v21 = vmul.f32 %v2223_v37, %v2223_v37  ;;  %v2227_v16 = vsub.f32 %v4106_v23, %v4169_v61 }
 0x378   : > { %v2256_v51 = vmul.f32 %v2224_v20, %v2224_v20  ;;  %v2257_v13 = vmul.f32 %v2225_v2, %v2225_v2  ;;  %v2228_v10 = vsub.f32 %v4120_v11, %v4169_v61  ;;  %v2258_v54 = vmul.f32 %v2226_v27, %v2226_v27 }
 0x379   : > { %v2274_v39 = vadd.f32 %v2273_v58, %v2243_v4  ;;  %v2229_v50 = vsub.f32 %v4116_v47, %v4169_v61  ;;  %v2259_v43 = vmul.f32 %v2227_v16, %v2227_v16  ;;  %v2230_v49 = vsub.f32 %v4130_v8, %v4169_v61 }
 0x37a   : > { %v2260_v4 = vmul.f32 %v2228_v10, %v2228_v10  ;;  %v2231_v23 = vsub.f32 %v4126_v22, %v4169_v61  ;;  %v2232_v11 = vsub.f32 %v4140_v6, %v4169_v61  ;;  %v2233_v47 = vsub.f32 %v4136_v17, %v4169_v61 }
 0x37b   : > { %v2275_v1 = vadd.f32 %v2274_v39, %v2244_v62  ;;  %v2261_v48 = vmul.f32 %v2229_v50, %v2229_v50  ;;  %v2262_v39 = vmul.f32 %v2230_v49, %v2230_v49  ;;  %v2234_v8 = vsub.f32 %v4150_v3, %v4169_v61 }
 0x37c   : > { %v2264_v40 = vmul.f32 %v2232_v11, %v2232_v11  ;;  %v2235_v22 = vsub.f32 %v4146_v56, %v4169_v61  ;;  %v2236_v6 = vsub.f32 %v4160_v31, %v4169_v61  ;;  %v2237_v17 = vsub.f32 %v4156_v52, %v4169_v61 }
 0x37d   : > { %v2276_v34 = vadd.f32 %v2275_v1, %v2245_v41  ;;  %v2263_v41 = vmul.f32 %v2231_v23, %v2231_v23 }
 0x37e   : > { %v2267_v44 = vmul.f32 %v2235_v22, %v2235_v22  ;;  %v2269_v59 = vmul.f32 %v2237_v17, %v2237_v17 }
 0x37f   : > { %v2277_v63 = vadd.f32 %v2276_v34, %v2246_v25  ;;  %v2265_v34 = vmul.f32 %v2233_v47, %v2233_v47 }
 0x381   : > { %v2278_v12 = vadd.f32 %v2277_v63, %v2247_v24  ;;  %v2266_v24 = vmul.f32 %v2234_v8, %v2234_v8 }
 0x383   : > { %v2279_v9 = vadd.f32 %v2278_v12, %v2248_v19  ;;  %v2268_v12 = vmul.f32 %v2236_v6, %v2236_v6 }
 0x385   : > { %v2280_v28 = vadd.f32 %v2279_v9, %v2249_v5 }
 0x387   : > { %v2281_v60 = vadd.f32 %v2280_v28, %v2250_v7 }
 0x389   : > { %v2282_v30 = vadd.f32 %v2281_v60, %v2251_v42 }
 0x38b   : > { %v2283_v14 = vadd.f32 %v2282_v30, %v2252_v32 }
 0x38d   : > { %v2284_v18 = vadd.f32 %v2283_v14, %v2253_v45 }
 0x38f   : > { %v2285_v15 = vadd.f32 %v2284_v18, %v2254_v53 }
 0x391   : > { %v2286_v57 = vadd.f32 %v2285_v15, %v2255_v21 }
 0x393   : > { %v2287_v46 = vadd.f32 %v2286_v57, %v2256_v51 }
 0x395   : > { %v2288_v35 = vadd.f32 %v2287_v46, %v2257_v13 }
 0x397   : > { %v2289_v26 = vadd.f32 %v2288_v35, %v2258_v54 }
 0x399   : > { %v2290_v58 = vadd.f32 %v2289_v26, %v2259_v43 }
 0x39b   : > { %v2291_v62 = vadd.f32 %v2290_v58, %v2260_v4 }
 0x39d   : > { %v2292_v38 = vadd.f32 %v2291_v62, %v2261_v48 }
 0x39f   : > { %v2293_v1 = vadd.f32 %v2292_v38, %v2262_v39 }
 0x3a1   : > { %v2294_v25 = vadd.f32 %v2293_v1, %v2263_v41 }
 0x3a3   : > { %v2295_v0 = vadd.f32 %v2294_v25, %v2264_v40 }
 0x3a5   : > { %v2296_v63 = vadd.f32 %v2295_v0, %v2265_v34 }
 0x3a7   : > { %v2297_v19 = vadd.f32 %v2296_v63, %v2266_v24 }
 0x3a9   : > { %v2298_v3 = vadd.f32 %v2297_v19, %v2267_v44 }
 0x3ab   : > { %v2299_v5 = vadd.f32 %v2298_v3, %v2268_v12 }
 0x3ad   : > { %v2300_v9 = vadd.f32 %v2299_v5, %v2269_v59 }
 0x3af   : > { %v2301_v33 = vrot.slane %v2300_v9, 4 }
 0x3b1   : > { %v2302_v56 = vadd.f32 %v2301_v33, %v2300_v9 }
 0x3b3   : > { %v2303_v7 = vrot.slane %v2302_v56, 2 }
 0x3b5   : > { %v2304_v28 = vadd.f32 %v2303_v7, %v2302_v56 }
 0x3b7   : > { %v2305_v36 = vrot.slane %v2304_v28, 1 }
 0x3b9   : > { %v2306_v31 = vadd.f32 %v2305_v36, %v2304_v28 }
 0x3bb   : > { %v2308_v52 = vsel %vm2307_vm10, %v4166_v55, %v2306_v31 }
 0x3bc   : > { %2309 = vst [vmem:[%s226_s22] sm:$0x3] %v2308_v52 }
 0x3bd PF: > { %s14_s14 = sadd.s32 1, %s2842_s14   ;;  %s4269_s12 = smov %s2838_s13 }
 0x3be   : > { %p11_p5 = scmp.ge.s32.totalorder %s14_s14, 4   ;;  %s4270_s13 = smov %s4272_s15 }
 0x3c0   :  { %13 = sbr.rel (!%p11_p5) target bundleno = 2 (0x2), region = 72 }

</bundles_post_ra>
